<compile_context>
chip_gen: v5e
topology: v5e:2x2
jax: 0.10.0
libtpu: 0.0.40
codegen_flags: <defaults>
</compile_context>

<pallas_src>
import jax
import jax.numpy as jnp
from jax.experimental import pallas as pl
from jax.experimental.pallas import tpu as pltpu

# ---------------- small synthetic config (mirrors ecg_cfg fields) -----------
B = 2              # batch
C = 4              # ECG leads / input channels
SEQ_LEN = 200      # ecg_cfg['seq_length']   (real model: 5000)
PATCH = 50         # ecg_cfg['patch_size']
D = 128            # ecg_cfg['width'] == hidden_size (real: 768; lane-aligned)
H = 4              # attention heads
HD = D // H        # head dim
P = SEQ_LEN // PATCH            # num_patches (== num_patches_per_side)
T = P + 1                       # +1 class token
TP = ((T + 7) // 8) * 8         # token axis padded to a sublane multiple
MLP = 4 * D
LAYERS = 2
EPS = 1e-5
CK = C * PATCH

assert D % 128 == 0 and D % H == 0, "width must be lane-aligned and split by heads"


def _ln(x, g, b):
    """Row-wise LayerNorm in f32."""
    mean = jnp.mean(x, axis=-1, keepdims=True)
    var = jnp.mean((x - mean) ** 2, axis=-1, keepdims=True)
    return (x - mean) * jax.lax.rsqrt(var + EPS) * g + b


# ---------------- fused kernel: embed (layer 0) + one transformer layer -----
def tower_kernel(patches_ref, pw_ref, pb_ref, cls_ref, pos_ref, lnpg_ref, lnpb_ref,
                 ln1g_ref, ln1b_ref, wqkv_ref, bqkv_ref, wo_ref, bo_ref,
                 ln2g_ref, ln2b_ref, w1_ref, b1_ref, w2_ref, b2_ref,
                 o_ref, q_sc, k_sc, v_sc):
    layer = pl.program_id(1)

    # --- layer 0: patch embed + cls + pos + ln_pre written straight into the
    #     resident activation (sliced stores; no jnp.concatenate). -------------
    @pl.when(layer == 0)
    def _embed():
        g, b = lnpg_ref[...], lnpb_ref[...]
        emb = jnp.dot(patches_ref[0].astype(jnp.bfloat16), pw_ref[...],
                      preferred_element_type=jnp.float32) + pb_ref[...]   # (P, D)
        o_ref[0, 0:1, :] = _ln(cls_ref[...] + pos_ref[0:1, :], g, b)
        o_ref[0, 1:T, :] = _ln(emb + pos_ref[1:T, :], g, b)
        if TP > T:  # zero padded token rows (masked out of attention below)
            o_ref[0, T:, :] = jnp.zeros((TP - T, D), jnp.float32)

    x = o_ref[0]                                       # (TP, D) f32, VMEM-resident

    # --- multi-head attention -------------------------------------------------
    h1 = _ln(x, ln1g_ref[0], ln1b_ref[0]).astype(jnp.bfloat16)
    qkv = jnp.dot(h1, wqkv_ref[0],
                  preferred_element_type=jnp.float32) + bqkv_ref[0]       # (TP, 3D)
    for hh in range(H):        # stage heads into (H, TP, HD) bf16 scratch
        q_sc[hh] = qkv[:, hh * HD:(hh + 1) * HD].astype(jnp.bfloat16)
        k_sc[hh] = qkv[:, D + hh * HD:D + (hh + 1) * HD].astype(jnp.bfloat16)
        v_sc[hh] = qkv[:, 2 * D + hh * HD:2 * D + (hh + 1) * HD].astype(jnp.bfloat16)
    q3, k3, v3 = q_sc[...], k_sc[...], v_sc[...]

    # single batched QK^T / softmax / PV across all heads (scale folded into Q)
    s = jnp.einsum('hqd,hkd->hqk', q3, k3,
                   preferred_element_type=jnp.float32)                    # (H, TP, TP)
    key_ok = jax.lax.broadcasted_iota(jnp.int32, (1, 1, TP), 2) < T
    s = jnp.where(key_ok, s, -1e30)                    # mask padded key tokens
    s = s - jnp.max(s, axis=-1, keepdims=True)
    p = jnp.exp(s)
    p = p * pl.reciprocal(jnp.sum(p, axis=-1, keepdims=True), approx=True)
    ctx = jnp.einsum('hqk,hkd->hqd', p.astype(jnp.bfloat16), v3,
                     preferred_element_type=jnp.float32)                  # (H, TP, HD)
    # batched per-head output projection; head-sum replaces the concat
    proj = jnp.einsum('hqd,hde->hqe', ctx.astype(jnp.bfloat16), wo_ref[0],
                      preferred_element_type=jnp.float32)                 # (H, TP, D)
    attn = proj[0]
    for hh in range(1, H):
        attn = attn + proj[hh]
    x = x + attn + bo_ref[0]

    # --- MLP -------------------------------------------------------------------
    h2 = _ln(x, ln2g_ref[0], ln2b_ref[0]).astype(jnp.bfloat16)
    h2 = jnp.dot(h2, w1_ref[0], preferred_element_type=jnp.float32) + b1_ref[0]
    # TODO(synk): PyTorch nn.GELU defaults to exact erf; tanh-approx GELU is kept
    # for robust Mosaic lowering (small, documented numerical deviation).
    h2 = jax.nn.gelu(h2, approximate=True).astype(jnp.bfloat16)
    x = x + jnp.dot(h2, w2_ref[0], preferred_element_type=jnp.float32) + b2_ref[0]

    o_ref[0] = x


# ---------------- pallas_call wrapper ----------------------------------------
def _const_spec(a):
    nd = a.ndim
    return pl.BlockSpec(a.shape, lambda *_, nd=nd: (0,) * nd)


def _layer_spec(a):
    nd = a.ndim
    return pl.BlockSpec((1,) + a.shape[1:],
                        lambda b, l, nd=nd: (l,) + (0,) * (nd - 1))


def tower_call(patches, prm):
    Bn = patches.shape[0]
    args = (patches, prm['patch_w'], prm['patch_b'], prm['cls'], prm['pos'],
            prm['ln_pre_g'], prm['ln_pre_b'],
            prm['ln1_g'], prm['ln1_b'], prm['w_qkv'], prm['b_qkv'],
            prm['w_o'], prm['b_o'], prm['ln2_g'], prm['ln2_b'],
            prm['w_fc1'], prm['b_fc1'], prm['w_fc2'], prm['b_fc2'])
    in_specs = ([pl.BlockSpec((1, P, CK), lambda b, l: (b, 0, 0))]
                + [_const_spec(a) for a in args[1:7]]
                + [_layer_spec(a) for a in args[7:]])
    return pl.pallas_call(
        tower_kernel,
        out_shape=jax.ShapeDtypeStruct((Bn, TP, D), jnp.float32),
        grid=(Bn, LAYERS),
        in_specs=in_specs,
        # same output block across the layer axis -> activation stays resident
        out_specs=pl.BlockSpec((1, TP, D), lambda b, l: (b, 0, 0)),
        scratch_shapes=[pltpu.VMEM((H, TP, HD), jnp.bfloat16),
                        pltpu.VMEM((H, TP, HD), jnp.bfloat16),
                        pltpu.VMEM((H, TP, HD), jnp.bfloat16)],
        compiler_params=pltpu.CompilerParams(
            dimension_semantics=("parallel", "arbitrary"),
            vmem_limit_bytes=48 * 1024 * 1024),
    )(*args)


# ---------------- deterministic parameter construction ------------------------
def init_params(key):
    keys = jax.random.split(key, 4 + LAYERS)
    s = 0.02
    f32 = jnp.float32
    params = {
        # Conv1d weight (D, C, PATCH) flattened to (C*PATCH, D) so that
        # patch @ w == conv1d(kernel=stride=PATCH)
        'patch_w': s * jax.random.normal(keys[0], (CK, D), f32),
        'patch_b': jnp.zeros((1, D), f32),
        'cls': s * jax.random.normal(keys[1], (1, D), f32),     # class_embedding
        'pos': s * jax.random.normal(keys[2], (T, D), f32),     # positional_embedding
        'ln_pre_g': jnp.ones((1, D), f32),
        'ln_pre_b': jnp.zeros((1, D), f32),
        'blocks': [],
    }
    for l in range(LAYERS):
        ks = jax.random.split(keys[4 + l], 4)
        params['blocks'].append({
            'ln1_g': jnp.ones((1, D), f32), 'ln1_b': jnp.zeros((1, D), f32),
            'w_qkv': s * jax.random.normal(ks[0], (D, 3 * D), f32),
            'b_qkv': jnp.zeros((1, 3 * D), f32),
            'w_o': s * jax.random.normal(ks[1], (D, D), f32),
            'b_o': jnp.zeros((1, D), f32),
            'ln2_g': jnp.ones((1, D), f32), 'ln2_b': jnp.zeros((1, D), f32),
            'w_fc1': s * jax.random.normal(ks[2], (D, MLP), f32),
            'b_fc1': jnp.zeros((1, MLP), f32),
            'w_fc2': s * jax.random.normal(ks[3], (MLP, D), f32),
            'b_fc2': jnp.zeros((1, D), f32),
        })
    return params


def prepare_params(params):
    """Stack per-layer params on a LAYERS axis, fold the 1/sqrt(HD) attention
    scale into the Q projection, reshape w_o to per-head form, and cast matmul
    weights to bf16 (f32 accumulation in-kernel)."""
    f32, bf16 = jnp.float32, jnp.bfloat16
    stack = lambda name: jnp.stack([bp[name] for bp in params['blocks']], axis=0)
    scale = 1.0 / (HD ** 0.5)
    qscale = jnp.concatenate([jnp.full((D,), scale, f32), jnp.ones((2 * D,), f32)])
    w_qkv = stack('w_qkv') * qscale                 # (L, D, 3D), Q columns scaled
    b_qkv = stack('b_qkv') * qscale                 # (L, 1, 3D)
    wo3 = stack('w_o').reshape(LAYERS, H, HD, D)    # rows are head-major
    return {
        'patch_w': params['patch_w'].astype(bf16),
        'patch_b': params['patch_b'],
        'cls': params['cls'], 'pos': params['pos'],
        'ln_pre_g': params['ln_pre_g'], 'ln_pre_b': params['ln_pre_b'],
        'ln1_g': stack('ln1_g'), 'ln1_b': stack('ln1_b'),
        'w_qkv': w_qkv.astype(bf16), 'b_qkv': b_qkv,
        'w_o': wo3.astype(bf16), 'b_o': stack('b_o'),
        'ln2_g': stack('ln2_g'), 'ln2_b': stack('ln2_b'),
        'w_fc1': stack('w_fc1').astype(bf16), 'b_fc1': stack('b_fc1'),
        'w_fc2': stack('w_fc2').astype(bf16), 'b_fc2': stack('b_fc2'),
    }


# ---------------- CLIPECGTower.forward equivalent -----------------------------
@jax.jit
def clip_ecg_tower_forward(ecgs, prm):
    """ecgs: (B, C, SEQ_LEN).  Returns last-transformer-layer hidden states
    (B, T, D) cast back to the input dtype (output_last_transformer_layer=True)."""
    in_dtype = ecgs.dtype
    x = ecgs.astype(jnp.float32)                  # .to(self.dtype)
    Bn = x.shape[0]
    # Conv1d(kernel=stride=PATCH) == non-overlapping patch extraction + matmul
    # (the matmul runs inside the kernel).
    # TODO(synk): at real SEQ_LEN fold this transpose into the kernel input DMA.
    patches = (x.reshape(Bn, C, P, PATCH)
                 .transpose(0, 2, 1, 3)
                 .reshape(Bn, P, CK))
    h = tower_call(patches, prm)
    return h[:, :T, :].astype(in_dtype)           # drop padded rows; .to(ecgs.dtype)


if __name__ == "__main__":
    key = jax.random.PRNGKey(0)
    k_param, k_data = jax.random.split(key)
    prm = prepare_params(init_params(k_param))
    ecgs = jax.random.normal(k_data, (B, C, SEQ_LEN), jnp.float32)
    out = clip_ecg_tower_forward(ecgs, prm)
    jax.block_until_ready(out)
    assert out.shape == (B, T, D) and out.dtype == ecgs.dtype
    assert bool(jnp.all(jnp.isfinite(out)))
    print("KERNEL_OK")
</pallas_src>

<mosaic_0001>
module attributes {stable_mosaic.version = 11 : i64} {
  func.func @tower_kernel(%arg0: i32, %arg1: i32, %arg2: memref<1x4x200xf32, #tpu.memory_space<vmem>>, %arg3: memref<200x128xbf16, #tpu.memory_space<vmem>>, %arg4: memref<1x128xf32, #tpu.memory_space<vmem>>, %arg5: memref<1x128xf32, #tpu.memory_space<vmem>>, %arg6: memref<5x128xf32, #tpu.memory_space<vmem>>, %arg7: memref<1x128xf32, #tpu.memory_space<vmem>>, %arg8: memref<1x128xf32, #tpu.memory_space<vmem>>, %arg9: memref<1x1x128xf32, #tpu.memory_space<vmem>>, %arg10: memref<1x1x128xf32, #tpu.memory_space<vmem>>, %arg11: memref<1x128x384xbf16, #tpu.memory_space<vmem>>, %arg12: memref<1x1x384xf32, #tpu.memory_space<vmem>>, %arg13: memref<1x4x32x128xbf16, #tpu.memory_space<vmem>>, %arg14: memref<1x1x128xf32, #tpu.memory_space<vmem>>, %arg15: memref<1x1x128xf32, #tpu.memory_space<vmem>>, %arg16: memref<1x1x128xf32, #tpu.memory_space<vmem>>, %arg17: memref<1x128x512xbf16, #tpu.memory_space<vmem>>, %arg18: memref<1x1x512xf32, #tpu.memory_space<vmem>>, %arg19: memref<1x512x128xbf16, #tpu.memory_space<vmem>>, %arg20: memref<1x1x128xf32, #tpu.memory_space<vmem>>, %arg21: memref<1x8x128xf32, #tpu.memory_space<vmem>>, %arg22: memref<4x8x32xbf16, #tpu.memory_space<vmem>>, %arg23: memref<4x8x32xbf16, #tpu.memory_space<vmem>>, %arg24: memref<4x8x32xbf16, #tpu.memory_space<vmem>>) attributes {dimension_semantics = [#tpu.dimension_semantics<parallel>, #tpu.dimension_semantics<arbitrary>], iteration_bounds = array<i64: 2, 2>, scalar_prefetch = 0 : i64, scratch_operands = 3 : i64, tpu.core_type = #tpu.core_type<tc>, window_params = [{transform_indices = @transform_0, window_bounds = array<i64: 1, 4, 200>}, {pipeline_mode = #tpu.pipeline_mode<synchronous>, transform_indices = @transform_1, window_bounds = array<i64: 200, 128>}, {pipeline_mode = #tpu.pipeline_mode<synchronous>, transform_indices = @transform_2, window_bounds = array<i64: 1, 128>}, {pipeline_mode = #tpu.pipeline_mode<synchronous>, transform_indices = @transform_3, window_bounds = array<i64: 1, 128>}, {pipeline_mode = #tpu.pipeline_mode<synchronous>, transform_indices = @transform_4, window_bounds = array<i64: 5, 128>}, {pipeline_mode = #tpu.pipeline_mode<synchronous>, transform_indices = @transform_5, window_bounds = array<i64: 1, 128>}, {pipeline_mode = #tpu.pipeline_mode<synchronous>, transform_indices = @transform_6, window_bounds = array<i64: 1, 128>}, {transform_indices = @transform_7, window_bounds = array<i64: 1, 1, 128>}, {transform_indices = @transform_8, window_bounds = array<i64: 1, 1, 128>}, {transform_indices = @transform_9, window_bounds = array<i64: 1, 128, 384>}, {transform_indices = @transform_10, window_bounds = array<i64: 1, 1, 384>}, {transform_indices = @transform_11, window_bounds = array<i64: 1, 4, 32, 128>}, {transform_indices = @transform_12, window_bounds = array<i64: 1, 1, 128>}, {transform_indices = @transform_13, window_bounds = array<i64: 1, 1, 128>}, {transform_indices = @transform_14, window_bounds = array<i64: 1, 1, 128>}, {transform_indices = @transform_15, window_bounds = array<i64: 1, 128, 512>}, {transform_indices = @transform_16, window_bounds = array<i64: 1, 1, 512>}, {transform_indices = @transform_17, window_bounds = array<i64: 1, 512, 128>}, {transform_indices = @transform_18, window_bounds = array<i64: 1, 1, 128>}, {transform_indices = @transform_19, window_bounds = array<i64: 1, 8, 128>}]} {
    %c0_i32 = arith.constant 0 : i32
    %0 = arith.cmpi eq, %arg1, %c0_i32 : i32
    %1 = arith.extui %0 : i1 to i32
    %c0_i32_0 = arith.constant 0 : i32
    %2 = arith.cmpi ne, %1, %c0_i32_0 : i32
    scf.if %2 {
      %c0_107 = arith.constant 0 : index
      %c0_108 = arith.constant 0 : index
      %201 = vector.load %arg7[%c0_107, %c0_108] : memref<1x128xf32, #tpu.memory_space<vmem>>, vector<1x128xf32>
      %c0_109 = arith.constant 0 : index
      %c0_110 = arith.constant 0 : index
      %202 = vector.load %arg8[%c0_109, %c0_110] : memref<1x128xf32, #tpu.memory_space<vmem>>, vector<1x128xf32>
      %c0_111 = arith.constant 0 : index
      %c0_112 = arith.constant 0 : index
      %c0_113 = arith.constant 0 : index
      %203 = vector.load %arg2[%c0_111, %c0_112, %c0_113] : memref<1x4x200xf32, #tpu.memory_space<vmem>>, vector<1x4x200xf32>
      %204 = vector.shape_cast %203 : vector<1x4x200xf32> to vector<4x200xf32>
      %205 = arith.truncf %204 : vector<4x200xf32> to vector<4x200xbf16>
      %c0_114 = arith.constant 0 : index
      %c0_115 = arith.constant 0 : index
      %206 = vector.load %arg3[%c0_114, %c0_115] : memref<200x128xbf16, #tpu.memory_space<vmem>>, vector<200x128xbf16>
      %cst_116 = arith.constant dense<0.000000e+00> : vector<4x128xf32>
      %207 = tpu.matmul %205, %206, %cst_116 {dimension_numbers = #tpu.dot_dimension_numbers<[1], [0], [0], [1], [0, 0, 1, 1], [], []>} : vector<4x200xbf16>, vector<200x128xbf16>, vector<4x128xf32> -> vector<4x128xf32>
      %c0_117 = arith.constant 0 : index
      %c0_118 = arith.constant 0 : index
      %208 = vector.load %arg4[%c0_117, %c0_118] : memref<1x128xf32, #tpu.memory_space<vmem>>, vector<1x128xf32>
      %209 = vector.broadcast %208 : vector<1x128xf32> to vector<4x128xf32>
      %210 = arith.addf %207, %209 : vector<4x128xf32>
      %c0_119 = arith.constant 0 : index
      %c0_120 = arith.constant 0 : index
      %211 = vector.load %arg5[%c0_119, %c0_120] : memref<1x128xf32, #tpu.memory_space<vmem>>, vector<1x128xf32>
      %c0_121 = arith.constant 0 : index
      %c0_122 = arith.constant 0 : index
      %212 = vector.load %arg6[%c0_121, %c0_122] : memref<5x128xf32, #tpu.memory_space<vmem>>, vector<1x128xf32>
      %213 = arith.addf %211, %212 : vector<1x128xf32>
      %cst_123 = arith.constant dense<0.000000e+00> : vector<1xf32>
      %214 = vector.multi_reduction <add>, %213, %cst_123 [1] : vector<1x128xf32> to vector<1xf32>
      %215 = vector.shape_cast %214 : vector<1xf32> to vector<1x1xf32>
      %cst_124 = arith.constant 1.280000e+02 : f32
      %216 = vector.broadcast %cst_124 : f32 to vector<1x1xf32>
      %217 = arith.divf %215, %216 : vector<1x1xf32>
      %218 = vector.broadcast %217 : vector<1x1xf32> to vector<1x128xf32>
      %219 = arith.subf %213, %218 : vector<1x128xf32>
      %220 = arith.mulf %219, %219 : vector<1x128xf32>
      %cst_125 = arith.constant dense<0.000000e+00> : vector<1xf32>
      %221 = vector.multi_reduction <add>, %220, %cst_125 [1] : vector<1x128xf32> to vector<1xf32>
      %222 = vector.shape_cast %221 : vector<1xf32> to vector<1x1xf32>
      %cst_126 = arith.constant 1.280000e+02 : f32
      %223 = vector.broadcast %cst_126 : f32 to vector<1x1xf32>
      %224 = arith.divf %222, %223 : vector<1x1xf32>
      %225 = vector.broadcast %217 : vector<1x1xf32> to vector<1x128xf32>
      %226 = arith.subf %213, %225 : vector<1x128xf32>
      %cst_127 = arith.constant 9.99999974E-6 : f32
      %227 = vector.broadcast %cst_127 : f32 to vector<1x1xf32>
      %228 = arith.addf %224, %227 : vector<1x1xf32>
      %229 = math.rsqrt %228 : vector<1x1xf32>
      %230 = vector.broadcast %229 : vector<1x1xf32> to vector<1x128xf32>
      %231 = arith.mulf %226, %230 : vector<1x128xf32>
      %232 = arith.mulf %231, %201 : vector<1x128xf32>
      %233 = arith.addf %232, %202 : vector<1x128xf32>
      %c0_128 = arith.constant 0 : index
      %c0_129 = arith.constant 0 : index
      %c0_130 = arith.constant 0 : index
      %234 = vector.load %arg21[%c0_128, %c0_129, %c0_130] : memref<1x8x128xf32, #tpu.memory_space<vmem>>, vector<1x1x128xf32>
      %235 = vector.shape_cast %234 : vector<1x1x128xf32> to vector<1x128xf32>
      %236 = vector.shape_cast %233 : vector<1x128xf32> to vector<1x1x128xf32>
      tpu.vector_store %arg21[%c0_128, %c0_129, %c0_130], %236 {strides = array<i32>} : memref<1x8x128xf32, #tpu.memory_space<vmem>>, vector<1x1x128xf32>,
      %c1_131 = arith.constant 1 : index
      %c0_132 = arith.constant 0 : index
      %237 = vector.load %arg6[%c1_131, %c0_132] : memref<5x128xf32, #tpu.memory_space<vmem>>, vector<4x128xf32>
      %238 = arith.addf %210, %237 : vector<4x128xf32>
      %cst_133 = arith.constant dense<0.000000e+00> : vector<4xf32>
      %239 = vector.multi_reduction <add>, %238, %cst_133 [1] : vector<4x128xf32> to vector<4xf32>
      %240 = vector.shape_cast %239 : vector<4xf32> to vector<4x1xf32>
      %cst_134 = arith.constant 1.280000e+02 : f32
      %241 = vector.broadcast %cst_134 : f32 to vector<4x1xf32>
      %242 = arith.divf %240, %241 : vector<4x1xf32>
      %243 = vector.broadcast %242 : vector<4x1xf32> to vector<4x128xf32>
      %244 = arith.subf %238, %243 : vector<4x128xf32>
      %245 = arith.mulf %244, %244 : vector<4x128xf32>
      %cst_135 = arith.constant dense<0.000000e+00> : vector<4xf32>
      %246 = vector.multi_reduction <add>, %245, %cst_135 [1] : vector<4x128xf32> to vector<4xf32>
      %247 = vector.shape_cast %246 : vector<4xf32> to vector<4x1xf32>
      %cst_136 = arith.constant 1.280000e+02 : f32
      %248 = vector.broadcast %cst_136 : f32 to vector<4x1xf32>
      %249 = arith.divf %247, %248 : vector<4x1xf32>
      %250 = vector.broadcast %242 : vector<4x1xf32> to vector<4x128xf32>
      %251 = arith.subf %238, %250 : vector<4x128xf32>
      %cst_137 = arith.constant 9.99999974E-6 : f32
      %252 = vector.broadcast %cst_137 : f32 to vector<4x1xf32>
      %253 = arith.addf %249, %252 : vector<4x1xf32>
      %254 = math.rsqrt %253 : vector<4x1xf32>
      %255 = vector.broadcast %254 : vector<4x1xf32> to vector<4x128xf32>
      %256 = arith.mulf %251, %255 : vector<4x128xf32>
      %257 = vector.broadcast %201 : vector<1x128xf32> to vector<4x128xf32>
      %258 = arith.mulf %256, %257 : vector<4x128xf32>
      %259 = vector.broadcast %202 : vector<1x128xf32> to vector<4x128xf32>
      %260 = arith.addf %258, %259 : vector<4x128xf32>
      %c0_138 = arith.constant 0 : index
      %c1_139 = arith.constant 1 : index
      %c0_140 = arith.constant 0 : index
      %261 = vector.load %arg21[%c0_138, %c1_139, %c0_140] : memref<1x8x128xf32, #tpu.memory_space<vmem>>, vector<1x4x128xf32>
      %262 = vector.shape_cast %261 : vector<1x4x128xf32> to vector<4x128xf32>
      %263 = vector.shape_cast %260 : vector<4x128xf32> to vector<1x4x128xf32>
      tpu.vector_store %arg21[%c0_138, %c1_139, %c0_140], %263 {strides = array<i32>} : memref<1x8x128xf32, #tpu.memory_space<vmem>>, vector<1x4x128xf32>,
      %cst_141 = arith.constant 0.000000e+00 : f32
      %264 = vector.broadcast %cst_141 : f32 to vector<3x128xf32>
      %c0_142 = arith.constant 0 : index
      %c5 = arith.constant 5 : index
      %c0_143 = arith.constant 0 : index
      %265 = vector.load %arg21[%c0_142, %c5, %c0_143] : memref<1x8x128xf32, #tpu.memory_space<vmem>>, vector<1x3x128xf32>
      %266 = vector.shape_cast %265 : vector<1x3x128xf32> to vector<3x128xf32>
      %267 = vector.shape_cast %264 : vector<3x128xf32> to vector<1x3x128xf32>
      tpu.vector_store %arg21[%c0_142, %c5, %c0_143], %267 {strides = array<i32>} : memref<1x8x128xf32, #tpu.memory_space<vmem>>, vector<1x3x128xf32>,
    } else {
    }
    %c0 = arith.constant 0 : index
    %c0_1 = arith.constant 0 : index
    %c0_2 = arith.constant 0 : index
    %3 = vector.load %arg21[%c0, %c0_1, %c0_2] : memref<1x8x128xf32, #tpu.memory_space<vmem>>, vector<1x8x128xf32>
    %4 = vector.shape_cast %3 : vector<1x8x128xf32> to vector<8x128xf32>
    %c0_3 = arith.constant 0 : index
    %c0_4 = arith.constant 0 : index
    %c0_5 = arith.constant 0 : index
    %5 = vector.load %arg9[%c0_3, %c0_4, %c0_5] : memref<1x1x128xf32, #tpu.memory_space<vmem>>, vector<1x1x128xf32>
    %6 = vector.shape_cast %5 : vector<1x1x128xf32> to vector<1x128xf32>
    %c0_6 = arith.constant 0 : index
    %c0_7 = arith.constant 0 : index
    %c0_8 = arith.constant 0 : index
    %7 = vector.load %arg10[%c0_6, %c0_7, %c0_8] : memref<1x1x128xf32, #tpu.memory_space<vmem>>, vector<1x1x128xf32>
    %8 = vector.shape_cast %7 : vector<1x1x128xf32> to vector<1x128xf32>
    %cst = arith.constant dense<0.000000e+00> : vector<8xf32>
    %9 = vector.multi_reduction <add>, %4, %cst [1] : vector<8x128xf32> to vector<8xf32>
    %10 = vector.shape_cast %9 : vector<8xf32> to vector<8x1xf32>
    %cst_9 = arith.constant 1.280000e+02 : f32
    %11 = vector.broadcast %cst_9 : f32 to vector<8x1xf32>
    %12 = arith.divf %10, %11 : vector<8x1xf32>
    %13 = vector.broadcast %12 : vector<8x1xf32> to vector<8x128xf32>
    %14 = arith.subf %4, %13 : vector<8x128xf32>
    %15 = arith.mulf %14, %14 : vector<8x128xf32>
    %cst_10 = arith.constant dense<0.000000e+00> : vector<8xf32>
    %16 = vector.multi_reduction <add>, %15, %cst_10 [1] : vector<8x128xf32> to vector<8xf32>
    %17 = vector.shape_cast %16 : vector<8xf32> to vector<8x1xf32>
    %cst_11 = arith.constant 1.280000e+02 : f32
    %18 = vector.broadcast %cst_11 : f32 to vector<8x1xf32>
    %19 = arith.divf %17, %18 : vector<8x1xf32>
    %20 = vector.broadcast %12 : vector<8x1xf32> to vector<8x128xf32>
    %21 = arith.subf %4, %20 : vector<8x128xf32>
    %cst_12 = arith.constant 9.99999974E-6 : f32
    %22 = vector.broadcast %cst_12 : f32 to vector<8x1xf32>
    %23 = arith.addf %19, %22 : vector<8x1xf32>
    %24 = math.rsqrt %23 : vector<8x1xf32>
    %25 = vector.broadcast %24 : vector<8x1xf32> to vector<8x128xf32>
    %26 = arith.mulf %21, %25 : vector<8x128xf32>
    %27 = vector.broadcast %6 : vector<1x128xf32> to vector<8x128xf32>
    %28 = arith.mulf %26, %27 : vector<8x128xf32>
    %29 = vector.broadcast %8 : vector<1x128xf32> to vector<8x128xf32>
    %30 = arith.addf %28, %29 : vector<8x128xf32>
    %31 = arith.truncf %30 : vector<8x128xf32> to vector<8x128xbf16>
    %c0_13 = arith.constant 0 : index
    %c0_14 = arith.constant 0 : index
    %c0_15 = arith.constant 0 : index
    %32 = vector.load %arg11[%c0_13, %c0_14, %c0_15] : memref<1x128x384xbf16, #tpu.memory_space<vmem>>, vector<1x128x384xbf16>
    %33 = vector.shape_cast %32 : vector<1x128x384xbf16> to vector<128x384xbf16>
    %cst_16 = arith.constant dense<0.000000e+00> : vector<8x384xf32>
    %34 = tpu.matmul %31, %33, %cst_16 {dimension_numbers = #tpu.dot_dimension_numbers<[1], [0], [0], [1], [0, 0, 1, 1], [], []>} : vector<8x128xbf16>, vector<128x384xbf16>, vector<8x384xf32> -> vector<8x384xf32>
    %c0_17 = arith.constant 0 : index
    %c0_18 = arith.constant 0 : index
    %c0_19 = arith.constant 0 : index
    %35 = vector.load %arg12[%c0_17, %c0_18, %c0_19] : memref<1x1x384xf32, #tpu.memory_space<vmem>>, vector<1x1x384xf32>
    %36 = vector.shape_cast %35 : vector<1x1x384xf32> to vector<1x384xf32>
    %37 = vector.broadcast %36 : vector<1x384xf32> to vector<8x384xf32>
    %38 = arith.addf %34, %37 : vector<8x384xf32>
    %39 = vector.extract_strided_slice %38 {offsets = [0, 0], sizes = [8, 32], strides = [1, 1]} : vector<8x384xf32> to vector<8x32xf32>
    %40 = arith.truncf %39 : vector<8x32xf32> to vector<8x32xbf16>
    %c0_20 = arith.constant 0 : index
    %c0_21 = arith.constant 0 : index
    %c0_22 = arith.constant 0 : index
    %41 = vector.load %arg22[%c0_20, %c0_21, %c0_22] : memref<4x8x32xbf16, #tpu.memory_space<vmem>>, vector<1x8x32xbf16>
    %42 = vector.shape_cast %41 : vector<1x8x32xbf16> to vector<8x32xbf16>
    %43 = vector.shape_cast %40 : vector<8x32xbf16> to vector<1x8x32xbf16>
    tpu.vector_store %arg22[%c0_20, %c0_21, %c0_22], %43 {strides = array<i32>} : memref<4x8x32xbf16, #tpu.memory_space<vmem>>, vector<1x8x32xbf16>,
    %44 = vector.extract_strided_slice %38 {offsets = [0, 128], sizes = [8, 32], strides = [1, 1]} : vector<8x384xf32> to vector<8x32xf32>
    %45 = arith.truncf %44 : vector<8x32xf32> to vector<8x32xbf16>
    %c0_23 = arith.constant 0 : index
    %c0_24 = arith.constant 0 : index
    %c0_25 = arith.constant 0 : index
    %46 = vector.load %arg23[%c0_23, %c0_24, %c0_25] : memref<4x8x32xbf16, #tpu.memory_space<vmem>>, vector<1x8x32xbf16>
    %47 = vector.shape_cast %46 : vector<1x8x32xbf16> to vector<8x32xbf16>
    %48 = vector.shape_cast %45 : vector<8x32xbf16> to vector<1x8x32xbf16>
    tpu.vector_store %arg23[%c0_23, %c0_24, %c0_25], %48 {strides = array<i32>} : memref<4x8x32xbf16, #tpu.memory_space<vmem>>, vector<1x8x32xbf16>,
    %49 = vector.extract_strided_slice %38 {offsets = [0, 256], sizes = [8, 32], strides = [1, 1]} : vector<8x384xf32> to vector<8x32xf32>
    %50 = arith.truncf %49 : vector<8x32xf32> to vector<8x32xbf16>
    %c0_26 = arith.constant 0 : index
    %c0_27 = arith.constant 0 : index
    %c0_28 = arith.constant 0 : index
    %51 = vector.load %arg24[%c0_26, %c0_27, %c0_28] : memref<4x8x32xbf16, #tpu.memory_space<vmem>>, vector<1x8x32xbf16>
    %52 = vector.shape_cast %51 : vector<1x8x32xbf16> to vector<8x32xbf16>
    %53 = vector.shape_cast %50 : vector<8x32xbf16> to vector<1x8x32xbf16>
    tpu.vector_store %arg24[%c0_26, %c0_27, %c0_28], %53 {strides = array<i32>} : memref<4x8x32xbf16, #tpu.memory_space<vmem>>, vector<1x8x32xbf16>,
    %54 = vector.extract_strided_slice %38 {offsets = [0, 32], sizes = [8, 32], strides = [1, 1]} : vector<8x384xf32> to vector<8x32xf32>
    %55 = arith.truncf %54 : vector<8x32xf32> to vector<8x32xbf16>
    %c1 = arith.constant 1 : index
    %c0_29 = arith.constant 0 : index
    %c0_30 = arith.constant 0 : index
    %56 = vector.load %arg22[%c1, %c0_29, %c0_30] : memref<4x8x32xbf16, #tpu.memory_space<vmem>>, vector<1x8x32xbf16>
    %57 = vector.shape_cast %56 : vector<1x8x32xbf16> to vector<8x32xbf16>
    %58 = vector.shape_cast %55 : vector<8x32xbf16> to vector<1x8x32xbf16>
    tpu.vector_store %arg22[%c1, %c0_29, %c0_30], %58 {strides = array<i32>} : memref<4x8x32xbf16, #tpu.memory_space<vmem>>, vector<1x8x32xbf16>,
    %59 = vector.extract_strided_slice %38 {offsets = [0, 160], sizes = [8, 32], strides = [1, 1]} : vector<8x384xf32> to vector<8x32xf32>
    %60 = arith.truncf %59 : vector<8x32xf32> to vector<8x32xbf16>
    %c1_31 = arith.constant 1 : index
    %c0_32 = arith.constant 0 : index
    %c0_33 = arith.constant 0 : index
    %61 = vector.load %arg23[%c1_31, %c0_32, %c0_33] : memref<4x8x32xbf16, #tpu.memory_space<vmem>>, vector<1x8x32xbf16>
    %62 = vector.shape_cast %61 : vector<1x8x32xbf16> to vector<8x32xbf16>
    %63 = vector.shape_cast %60 : vector<8x32xbf16> to vector<1x8x32xbf16>
    tpu.vector_store %arg23[%c1_31, %c0_32, %c0_33], %63 {strides = array<i32>} : memref<4x8x32xbf16, #tpu.memory_space<vmem>>, vector<1x8x32xbf16>,
    %64 = vector.extract_strided_slice %38 {offsets = [0, 288], sizes = [8, 32], strides = [1, 1]} : vector<8x384xf32> to vector<8x32xf32>
    %65 = arith.truncf %64 : vector<8x32xf32> to vector<8x32xbf16>
    %c1_34 = arith.constant 1 : index
    %c0_35 = arith.constant 0 : index
    %c0_36 = arith.constant 0 : index
    %66 = vector.load %arg24[%c1_34, %c0_35, %c0_36] : memref<4x8x32xbf16, #tpu.memory_space<vmem>>, vector<1x8x32xbf16>
    %67 = vector.shape_cast %66 : vector<1x8x32xbf16> to vector<8x32xbf16>
    %68 = vector.shape_cast %65 : vector<8x32xbf16> to vector<1x8x32xbf16>
    tpu.vector_store %arg24[%c1_34, %c0_35, %c0_36], %68 {strides = array<i32>} : memref<4x8x32xbf16, #tpu.memory_space<vmem>>, vector<1x8x32xbf16>,
    %69 = vector.extract_strided_slice %38 {offsets = [0, 64], sizes = [8, 32], strides = [1, 1]} : vector<8x384xf32> to vector<8x32xf32>
    %70 = arith.truncf %69 : vector<8x32xf32> to vector<8x32xbf16>
    %c2 = arith.constant 2 : index
    %c0_37 = arith.constant 0 : index
    %c0_38 = arith.constant 0 : index
    %71 = vector.load %arg22[%c2, %c0_37, %c0_38] : memref<4x8x32xbf16, #tpu.memory_space<vmem>>, vector<1x8x32xbf16>
    %72 = vector.shape_cast %71 : vector<1x8x32xbf16> to vector<8x32xbf16>
    %73 = vector.shape_cast %70 : vector<8x32xbf16> to vector<1x8x32xbf16>
    tpu.vector_store %arg22[%c2, %c0_37, %c0_38], %73 {strides = array<i32>} : memref<4x8x32xbf16, #tpu.memory_space<vmem>>, vector<1x8x32xbf16>,
    %74 = vector.extract_strided_slice %38 {offsets = [0, 192], sizes = [8, 32], strides = [1, 1]} : vector<8x384xf32> to vector<8x32xf32>
    %75 = arith.truncf %74 : vector<8x32xf32> to vector<8x32xbf16>
    %c2_39 = arith.constant 2 : index
    %c0_40 = arith.constant 0 : index
    %c0_41 = arith.constant 0 : index
    %76 = vector.load %arg23[%c2_39, %c0_40, %c0_41] : memref<4x8x32xbf16, #tpu.memory_space<vmem>>, vector<1x8x32xbf16>
    %77 = vector.shape_cast %76 : vector<1x8x32xbf16> to vector<8x32xbf16>
    %78 = vector.shape_cast %75 : vector<8x32xbf16> to vector<1x8x32xbf16>
    tpu.vector_store %arg23[%c2_39, %c0_40, %c0_41], %78 {strides = array<i32>} : memref<4x8x32xbf16, #tpu.memory_space<vmem>>, vector<1x8x32xbf16>,
    %79 = vector.extract_strided_slice %38 {offsets = [0, 320], sizes = [8, 32], strides = [1, 1]} : vector<8x384xf32> to vector<8x32xf32>
    %80 = arith.truncf %79 : vector<8x32xf32> to vector<8x32xbf16>
    %c2_42 = arith.constant 2 : index
    %c0_43 = arith.constant 0 : index
    %c0_44 = arith.constant 0 : index
    %81 = vector.load %arg24[%c2_42, %c0_43, %c0_44] : memref<4x8x32xbf16, #tpu.memory_space<vmem>>, vector<1x8x32xbf16>
    %82 = vector.shape_cast %81 : vector<1x8x32xbf16> to vector<8x32xbf16>
    %83 = vector.shape_cast %80 : vector<8x32xbf16> to vector<1x8x32xbf16>
    tpu.vector_store %arg24[%c2_42, %c0_43, %c0_44], %83 {strides = array<i32>} : memref<4x8x32xbf16, #tpu.memory_space<vmem>>, vector<1x8x32xbf16>,
    %84 = vector.extract_strided_slice %38 {offsets = [0, 96], sizes = [8, 32], strides = [1, 1]} : vector<8x384xf32> to vector<8x32xf32>
    %85 = arith.truncf %84 : vector<8x32xf32> to vector<8x32xbf16>
    %c3 = arith.constant 3 : index
    %c0_45 = arith.constant 0 : index
    %c0_46 = arith.constant 0 : index
    %86 = vector.load %arg22[%c3, %c0_45, %c0_46] : memref<4x8x32xbf16, #tpu.memory_space<vmem>>, vector<1x8x32xbf16>
    %87 = vector.shape_cast %86 : vector<1x8x32xbf16> to vector<8x32xbf16>
    %88 = vector.shape_cast %85 : vector<8x32xbf16> to vector<1x8x32xbf16>
    tpu.vector_store %arg22[%c3, %c0_45, %c0_46], %88 {strides = array<i32>} : memref<4x8x32xbf16, #tpu.memory_space<vmem>>, vector<1x8x32xbf16>,
    %89 = vector.extract_strided_slice %38 {offsets = [0, 224], sizes = [8, 32], strides = [1, 1]} : vector<8x384xf32> to vector<8x32xf32>
    %90 = arith.truncf %89 : vector<8x32xf32> to vector<8x32xbf16>
    %c3_47 = arith.constant 3 : index
    %c0_48 = arith.constant 0 : index
    %c0_49 = arith.constant 0 : index
    %91 = vector.load %arg23[%c3_47, %c0_48, %c0_49] : memref<4x8x32xbf16, #tpu.memory_space<vmem>>, vector<1x8x32xbf16>
    %92 = vector.shape_cast %91 : vector<1x8x32xbf16> to vector<8x32xbf16>
    %93 = vector.shape_cast %90 : vector<8x32xbf16> to vector<1x8x32xbf16>
    tpu.vector_store %arg23[%c3_47, %c0_48, %c0_49], %93 {strides = array<i32>} : memref<4x8x32xbf16, #tpu.memory_space<vmem>>, vector<1x8x32xbf16>,
    %94 = vector.extract_strided_slice %38 {offsets = [0, 352], sizes = [8, 32], strides = [1, 1]} : vector<8x384xf32> to vector<8x32xf32>
    %95 = arith.truncf %94 : vector<8x32xf32> to vector<8x32xbf16>
    %c3_50 = arith.constant 3 : index
    %c0_51 = arith.constant 0 : index
    %c0_52 = arith.constant 0 : index
    %96 = vector.load %arg24[%c3_50, %c0_51, %c0_52] : memref<4x8x32xbf16, #tpu.memory_space<vmem>>, vector<1x8x32xbf16>
    %97 = vector.shape_cast %96 : vector<1x8x32xbf16> to vector<8x32xbf16>
    %98 = vector.shape_cast %95 : vector<8x32xbf16> to vector<1x8x32xbf16>
    tpu.vector_store %arg24[%c3_50, %c0_51, %c0_52], %98 {strides = array<i32>} : memref<4x8x32xbf16, #tpu.memory_space<vmem>>, vector<1x8x32xbf16>,
    %c0_53 = arith.constant 0 : index
    %c0_54 = arith.constant 0 : index
    %c0_55 = arith.constant 0 : index
    %99 = vector.load %arg22[%c0_53, %c0_54, %c0_55] : memref<4x8x32xbf16, #tpu.memory_space<vmem>>, vector<4x8x32xbf16>
    %c0_56 = arith.constant 0 : index
    %c0_57 = arith.constant 0 : index
    %c0_58 = arith.constant 0 : index
    %100 = vector.load %arg23[%c0_56, %c0_57, %c0_58] : memref<4x8x32xbf16, #tpu.memory_space<vmem>>, vector<4x8x32xbf16>
    %c0_59 = arith.constant 0 : index
    %c0_60 = arith.constant 0 : index
    %c0_61 = arith.constant 0 : index
    %101 = vector.load %arg24[%c0_59, %c0_60, %c0_61] : memref<4x8x32xbf16, #tpu.memory_space<vmem>>, vector<4x8x32xbf16>
    "tpu.trace_start"() <{level = 10 : i32, message = "hqd,hkd->hqk"}> : () -> ()
    %cst_62 = arith.constant dense<0.000000e+00> : vector<4x8x8xf32>
    %102 = tpu.matmul %99, %100, %cst_62 {dimension_numbers = #tpu.dot_dimension_numbers<[2], [2], [1], [1], [0, 0, 0, 1, 1, 1], [0], [0]>} : vector<4x8x32xbf16>, vector<4x8x32xbf16>, vector<4x8x8xf32> -> vector<4x8x8xf32>
    "tpu.trace_stop"() : () -> ()
    %103 = tpu.iota {dimensions = array<i32: 2>} : vector<1x1x8xi32>
    %c5_i32 = arith.constant 5 : i32
    %104 = vector.broadcast %c5_i32 : i32 to vector<1x1x8xi32>
    %105 = arith.cmpi slt, %103, %104 : vector<1x1x8xi32>
    %cst_63 = arith.constant -1.000000e+30 : f32
    %106 = vector.shape_cast %105 : vector<1x1x8xi1> to vector<1x1x8xi1>
    %107 = vector.broadcast %106 : vector<1x1x8xi1> to vector<4x8x8xi1>
    %108 = vector.broadcast %cst_63 : f32 to vector<4x8x8xf32>
    %109 = arith.select %107, %102, %108 : vector<4x8x8xi1>, vector<4x8x8xf32>
    %cst_64 = arith.constant dense<0xFF800000> : vector<4x8xf32>
    %110 = vector.multi_reduction <maximumf>, %109, %cst_64 [2] : vector<4x8x8xf32> to vector<4x8xf32>
    %111 = vector.shape_cast %110 : vector<4x8xf32> to vector<4x8x1xf32>
    %112 = vector.broadcast %111 : vector<4x8x1xf32> to vector<4x8x8xf32>
    %113 = arith.subf %109, %112 : vector<4x8x8xf32>
    %114 = math.exp %113 : vector<4x8x8xf32>
    %cst_65 = arith.constant dense<0.000000e+00> : vector<4x8xf32>
    %115 = vector.multi_reduction <add>, %114, %cst_65 [2] : vector<4x8x8xf32> to vector<4x8xf32>
    %116 = vector.shape_cast %115 : vector<4x8xf32> to vector<4x8x1xf32>
    %117 = tpu.reciprocal %116 {approx = true} : vector<4x8x1xf32> -> vector<4x8x1xf32>
    %118 = vector.broadcast %117 : vector<4x8x1xf32> to vector<4x8x8xf32>
    %119 = arith.mulf %114, %118 : vector<4x8x8xf32>
    %120 = arith.truncf %119 : vector<4x8x8xf32> to vector<4x8x8xbf16>
    "tpu.trace_start"() <{level = 10 : i32, message = "hqk,hkd->hqd"}> : () -> ()
    %cst_66 = arith.constant dense<0.000000e+00> : vector<4x8x32xf32>
    %121 = tpu.matmul %120, %101, %cst_66 {dimension_numbers = #tpu.dot_dimension_numbers<[2], [1], [1], [2], [0, 0, 0, 1, 1, 2], [0], [0]>} : vector<4x8x8xbf16>, vector<4x8x32xbf16>, vector<4x8x32xf32> -> vector<4x8x32xf32>
    "tpu.trace_stop"() : () -> ()
    %122 = arith.truncf %121 : vector<4x8x32xf32> to vector<4x8x32xbf16>
    %c0_67 = arith.constant 0 : index
    %c0_68 = arith.constant 0 : index
    %c0_69 = arith.constant 0 : index
    %c0_70 = arith.constant 0 : index
    %123 = vector.load %arg13[%c0_67, %c0_68, %c0_69, %c0_70] : memref<1x4x32x128xbf16, #tpu.memory_space<vmem>>, vector<1x4x32x128xbf16>
    %124 = vector.shape_cast %123 : vector<1x4x32x128xbf16> to vector<4x32x128xbf16>
    "tpu.trace_start"() <{level = 10 : i32, message = "hqd,hde->hqe"}> : () -> ()
    %cst_71 = arith.constant dense<0.000000e+00> : vector<4x8x128xf32>
    %125 = tpu.matmul %122, %124, %cst_71 {dimension_numbers = #tpu.dot_dimension_numbers<[2], [1], [1], [2], [0, 0, 0, 1, 1, 2], [0], [0]>} : vector<4x8x32xbf16>, vector<4x32x128xbf16>, vector<4x8x128xf32> -> vector<4x8x128xf32>
    "tpu.trace_stop"() : () -> ()
    %126 = vector.extract_strided_slice %125 {offsets = [0, 0, 0], sizes = [1, 8, 128], strides = [1, 1, 1]} : vector<4x8x128xf32> to vector<1x8x128xf32>
    %127 = vector.shape_cast %126 : vector<1x8x128xf32> to vector<8x128xf32>
    %128 = vector.extract_strided_slice %125 {offsets = [1, 0, 0], sizes = [1, 8, 128], strides = [1, 1, 1]} : vector<4x8x128xf32> to vector<1x8x128xf32>
    %129 = vector.shape_cast %128 : vector<1x8x128xf32> to vector<8x128xf32>
    %130 = arith.addf %127, %129 : vector<8x128xf32>
    %131 = vector.extract_strided_slice %125 {offsets = [2, 0, 0], sizes = [1, 8, 128], strides = [1, 1, 1]} : vector<4x8x128xf32> to vector<1x8x128xf32>
    %132 = vector.shape_cast %131 : vector<1x8x128xf32> to vector<8x128xf32>
    %133 = arith.addf %130, %132 : vector<8x128xf32>
    %134 = vector.extract_strided_slice %125 {offsets = [3, 0, 0], sizes = [1, 8, 128], strides = [1, 1, 1]} : vector<4x8x128xf32> to vector<1x8x128xf32>
    %135 = vector.shape_cast %134 : vector<1x8x128xf32> to vector<8x128xf32>
    %136 = arith.addf %133, %135 : vector<8x128xf32>
    %137 = arith.addf %4, %136 : vector<8x128xf32>
    %c0_72 = arith.constant 0 : index
    %c0_73 = arith.constant 0 : index
    %c0_74 = arith.constant 0 : index
    %138 = vector.load %arg14[%c0_72, %c0_73, %c0_74] : memref<1x1x128xf32, #tpu.memory_space<vmem>>, vector<1x1x128xf32>
    %139 = vector.shape_cast %138 : vector<1x1x128xf32> to vector<1x128xf32>
    %140 = vector.broadcast %139 : vector<1x128xf32> to vector<8x128xf32>
    %141 = arith.addf %137, %140 : vector<8x128xf32>
    %c0_75 = arith.constant 0 : index
    %c0_76 = arith.constant 0 : index
    %c0_77 = arith.constant 0 : index
    %142 = vector.load %arg15[%c0_75, %c0_76, %c0_77] : memref<1x1x128xf32, #tpu.memory_space<vmem>>, vector<1x1x128xf32>
    %143 = vector.shape_cast %142 : vector<1x1x128xf32> to vector<1x128xf32>
    %c0_78 = arith.constant 0 : index
    %c0_79 = arith.constant 0 : index
    %c0_80 = arith.constant 0 : index
    %144 = vector.load %arg16[%c0_78, %c0_79, %c0_80] : memref<1x1x128xf32, #tpu.memory_space<vmem>>, vector<1x1x128xf32>
    %145 = vector.shape_cast %144 : vector<1x1x128xf32> to vector<1x128xf32>
    %cst_81 = arith.constant dense<0.000000e+00> : vector<8xf32>
    %146 = vector.multi_reduction <add>, %141, %cst_81 [1] : vector<8x128xf32> to vector<8xf32>
    %147 = vector.shape_cast %146 : vector<8xf32> to vector<8x1xf32>
    %cst_82 = arith.constant 1.280000e+02 : f32
    %148 = vector.broadcast %cst_82 : f32 to vector<8x1xf32>
    %149 = arith.divf %147, %148 : vector<8x1xf32>
    %150 = vector.broadcast %149 : vector<8x1xf32> to vector<8x128xf32>
    %151 = arith.subf %141, %150 : vector<8x128xf32>
    %152 = arith.mulf %151, %151 : vector<8x128xf32>
    %cst_83 = arith.constant dense<0.000000e+00> : vector<8xf32>
    %153 = vector.multi_reduction <add>, %152, %cst_83 [1] : vector<8x128xf32> to vector<8xf32>
    %154 = vector.shape_cast %153 : vector<8xf32> to vector<8x1xf32>
    %cst_84 = arith.constant 1.280000e+02 : f32
    %155 = vector.broadcast %cst_84 : f32 to vector<8x1xf32>
    %156 = arith.divf %154, %155 : vector<8x1xf32>
    %157 = vector.broadcast %149 : vector<8x1xf32> to vector<8x128xf32>
    %158 = arith.subf %141, %157 : vector<8x128xf32>
    %cst_85 = arith.constant 9.99999974E-6 : f32
    %159 = vector.broadcast %cst_85 : f32 to vector<8x1xf32>
    %160 = arith.addf %156, %159 : vector<8x1xf32>
    %161 = math.rsqrt %160 : vector<8x1xf32>
    %162 = vector.broadcast %161 : vector<8x1xf32> to vector<8x128xf32>
    %163 = arith.mulf %158, %162 : vector<8x128xf32>
    %164 = vector.broadcast %143 : vector<1x128xf32> to vector<8x128xf32>
    %165 = arith.mulf %163, %164 : vector<8x128xf32>
    %166 = vector.broadcast %145 : vector<1x128xf32> to vector<8x128xf32>
    %167 = arith.addf %165, %166 : vector<8x128xf32>
    %168 = arith.truncf %167 : vector<8x128xf32> to vector<8x128xbf16>
    %c0_86 = arith.constant 0 : index
    %c0_87 = arith.constant 0 : index
    %c0_88 = arith.constant 0 : index
    %169 = vector.load %arg17[%c0_86, %c0_87, %c0_88] : memref<1x128x512xbf16, #tpu.memory_space<vmem>>, vector<1x128x512xbf16>
    %170 = vector.shape_cast %169 : vector<1x128x512xbf16> to vector<128x512xbf16>
    %cst_89 = arith.constant dense<0.000000e+00> : vector<8x512xf32>
    %171 = tpu.matmul %168, %170, %cst_89 {dimension_numbers = #tpu.dot_dimension_numbers<[1], [0], [0], [1], [0, 0, 1, 1], [], []>} : vector<8x128xbf16>, vector<128x512xbf16>, vector<8x512xf32> -> vector<8x512xf32>
    %c0_90 = arith.constant 0 : index
    %c0_91 = arith.constant 0 : index
    %c0_92 = arith.constant 0 : index
    %172 = vector.load %arg18[%c0_90, %c0_91, %c0_92] : memref<1x1x512xf32, #tpu.memory_space<vmem>>, vector<1x1x512xf32>
    %173 = vector.shape_cast %172 : vector<1x1x512xf32> to vector<1x512xf32>
    %174 = vector.broadcast %173 : vector<1x512xf32> to vector<8x512xf32>
    %175 = arith.addf %171, %174 : vector<8x512xf32>
    %176 = arith.mulf %175, %175 : vector<8x512xf32>
    %177 = arith.mulf %175, %176 : vector<8x512xf32>
    %cst_93 = arith.constant 4.471500e-02 : f32
    %178 = vector.broadcast %cst_93 : f32 to vector<8x512xf32>
    %179 = arith.mulf %178, %177 : vector<8x512xf32>
    %180 = arith.addf %175, %179 : vector<8x512xf32>
    %cst_94 = arith.constant 0.797884583 : f32
    %181 = vector.broadcast %cst_94 : f32 to vector<8x512xf32>
    %182 = arith.mulf %181, %180 : vector<8x512xf32>
    %183 = math.tanh %182 : vector<8x512xf32>
    %cst_95 = arith.constant 1.000000e+00 : f32
    %184 = vector.broadcast %cst_95 : f32 to vector<8x512xf32>
    %185 = arith.addf %184, %183 : vector<8x512xf32>
    %cst_96 = arith.constant 5.000000e-01 : f32
    %186 = vector.broadcast %cst_96 : f32 to vector<8x512xf32>
    %187 = arith.mulf %186, %185 : vector<8x512xf32>
    %188 = arith.mulf %175, %187 : vector<8x512xf32>
    %189 = arith.truncf %188 : vector<8x512xf32> to vector<8x512xbf16>
    %c0_97 = arith.constant 0 : index
    %c0_98 = arith.constant 0 : index
    %c0_99 = arith.constant 0 : index
    %190 = vector.load %arg19[%c0_97, %c0_98, %c0_99] : memref<1x512x128xbf16, #tpu.memory_space<vmem>>, vector<1x512x128xbf16>
    %191 = vector.shape_cast %190 : vector<1x512x128xbf16> to vector<512x128xbf16>
    %cst_100 = arith.constant dense<0.000000e+00> : vector<8x128xf32>
    %192 = tpu.matmul %189, %191, %cst_100 {dimension_numbers = #tpu.dot_dimension_numbers<[1], [0], [0], [1], [0, 0, 1, 1], [], []>} : vector<8x512xbf16>, vector<512x128xbf16>, vector<8x128xf32> -> vector<8x128xf32>
    %193 = arith.addf %141, %192 : vector<8x128xf32>
    %c0_101 = arith.constant 0 : index
    %c0_102 = arith.constant 0 : index
    %c0_103 = arith.constant 0 : index
    %194 = vector.load %arg20[%c0_101, %c0_102, %c0_103] : memref<1x1x128xf32, #tpu.memory_space<vmem>>, vector<1x1x128xf32>
    %195 = vector.shape_cast %194 : vector<1x1x128xf32> to vector<1x128xf32>
    %196 = vector.broadcast %195 : vector<1x128xf32> to vector<8x128xf32>
    %197 = arith.addf %193, %196 : vector<8x128xf32>
    %c0_104 = arith.constant 0 : index
    %c0_105 = arith.constant 0 : index
    %c0_106 = arith.constant 0 : index
    %198 = vector.load %arg21[%c0_104, %c0_105, %c0_106] : memref<1x8x128xf32, #tpu.memory_space<vmem>>, vector<1x8x128xf32>
    %199 = vector.shape_cast %198 : vector<1x8x128xf32> to vector<8x128xf32>
    %200 = vector.shape_cast %197 : vector<8x128xf32> to vector<1x8x128xf32>
    tpu.vector_store %arg21[%c0_104, %c0_105, %c0_106], %200 {strides = array<i32>} : memref<1x8x128xf32, #tpu.memory_space<vmem>>, vector<1x8x128xf32>,
    return
  }
  func.func @transform_0(%arg0: i32, %arg1: i32) -> (i32, i32, i32) {
    %c0_i32 = arith.constant 0 : i32
    %c0_i32_0 = arith.constant 0 : i32
    %c0_i32_1 = arith.constant 0 : i32
    return %arg0, %c0_i32, %c0_i32_0 : i32, i32, i32
  }
  func.func @transform_1(%arg0: i32, %arg1: i32) -> (i32, i32) {
    %c0_i32 = arith.constant 0 : i32
    %c0_i32_0 = arith.constant 0 : i32
    %c0_i32_1 = arith.constant 0 : i32
    return %c0_i32, %c0_i32_0 : i32, i32
  }
  func.func @transform_2(%arg0: i32, %arg1: i32) -> (i32, i32) {
    %c0_i32 = arith.constant 0 : i32
    %c0_i32_0 = arith.constant 0 : i32
    %c0_i32_1 = arith.constant 0 : i32
    return %c0_i32, %c0_i32_0 : i32, i32
  }
  func.func @transform_3(%arg0: i32, %arg1: i32) -> (i32, i32) {
    %c0_i32 = arith.constant 0 : i32
    %c0_i32_0 = arith.constant 0 : i32
    %c0_i32_1 = arith.constant 0 : i32
    return %c0_i32, %c0_i32_0 : i32, i32
  }
  func.func @transform_4(%arg0: i32, %arg1: i32) -> (i32, i32) {
    %c0_i32 = arith.constant 0 : i32
    %c0_i32_0 = arith.constant 0 : i32
    %c0_i32_1 = arith.constant 0 : i32
    return %c0_i32, %c0_i32_0 : i32, i32
  }
  func.func @transform_5(%arg0: i32, %arg1: i32) -> (i32, i32) {
    %c0_i32 = arith.constant 0 : i32
    %c0_i32_0 = arith.constant 0 : i32
    %c0_i32_1 = arith.constant 0 : i32
    return %c0_i32, %c0_i32_0 : i32, i32
  }
  func.func @transform_6(%arg0: i32, %arg1: i32) -> (i32, i32) {
    %c0_i32 = arith.constant 0 : i32
    %c0_i32_0 = arith.constant 0 : i32
    %c0_i32_1 = arith.constant 0 : i32
    return %c0_i32, %c0_i32_0 : i32, i32
  }
  func.func @transform_7(%arg0: i32, %arg1: i32) -> (i32, i32, i32) {
    %c0_i32 = arith.constant 0 : i32
    %c0_i32_0 = arith.constant 0 : i32
    %c0_i32_1 = arith.constant 0 : i32
    return %arg1, %c0_i32, %c0_i32_0 : i32, i32, i32
  }
  func.func @transform_8(%arg0: i32, %arg1: i32) -> (i32, i32, i32) {
    %c0_i32 = arith.constant 0 : i32
    %c0_i32_0 = arith.constant 0 : i32
    %c0_i32_1 = arith.constant 0 : i32
    return %arg1, %c0_i32, %c0_i32_0 : i32, i32, i32
  }
  func.func @transform_9(%arg0: i32, %arg1: i32) -> (i32, i32, i32) {
    %c0_i32 = arith.constant 0 : i32
    %c0_i32_0 = arith.constant 0 : i32
    %c0_i32_1 = arith.constant 0 : i32
    return %arg1, %c0_i32, %c0_i32_0 : i32, i32, i32
  }
  func.func @transform_10(%arg0: i32, %arg1: i32) -> (i32, i32, i32) {
    %c0_i32 = arith.constant 0 : i32
    %c0_i32_0 = arith.constant 0 : i32
    %c0_i32_1 = arith.constant 0 : i32
    return %arg1, %c0_i32, %c0_i32_0 : i32, i32, i32
  }
  func.func @transform_11(%arg0: i32, %arg1: i32) -> (i32, i32, i32, i32) {
    %c0_i32 = arith.constant 0 : i32
    %c0_i32_0 = arith.constant 0 : i32
    %c0_i32_1 = arith.constant 0 : i32
    %c0_i32_2 = arith.constant 0 : i32
    return %arg1, %c0_i32, %c0_i32_0, %c0_i32_1 : i32, i32, i32, i32
  }
  func.func @transform_12(%arg0: i32, %arg1: i32) -> (i32, i32, i32) {
    %c0_i32 = arith.constant 0 : i32
    %c0_i32_0 = arith.constant 0 : i32
    %c0_i32_1 = arith.constant 0 : i32
    return %arg1, %c0_i32, %c0_i32_0 : i32, i32, i32
  }
  func.func @transform_13(%arg0: i32, %arg1: i32) -> (i32, i32, i32) {
    %c0_i32 = arith.constant 0 : i32
    %c0_i32_0 = arith.constant 0 : i32
    %c0_i32_1 = arith.constant 0 : i32
    return %arg1, %c0_i32, %c0_i32_0 : i32, i32, i32
  }
  func.func @transform_14(%arg0: i32, %arg1: i32) -> (i32, i32, i32) {
    %c0_i32 = arith.constant 0 : i32
    %c0_i32_0 = arith.constant 0 : i32
    %c0_i32_1 = arith.constant 0 : i32
    return %arg1, %c0_i32, %c0_i32_0 : i32, i32, i32
  }
  func.func @transform_15(%arg0: i32, %arg1: i32) -> (i32, i32, i32) {
    %c0_i32 = arith.constant 0 : i32
    %c0_i32_0 = arith.constant 0 : i32
    %c0_i32_1 = arith.constant 0 : i32
    return %arg1, %c0_i32, %c0_i32_0 : i32, i32, i32
  }
  func.func @transform_16(%arg0: i32, %arg1: i32) -> (i32, i32, i32) {
    %c0_i32 = arith.constant 0 : i32
    %c0_i32_0 = arith.constant 0 : i32
    %c0_i32_1 = arith.constant 0 : i32
    return %arg1, %c0_i32, %c0_i32_0 : i32, i32, i32
  }
  func.func @transform_17(%arg0: i32, %arg1: i32) -> (i32, i32, i32) {
    %c0_i32 = arith.constant 0 : i32
    %c0_i32_0 = arith.constant 0 : i32
    %c0_i32_1 = arith.constant 0 : i32
    return %arg1, %c0_i32, %c0_i32_0 : i32, i32, i32
  }
  func.func @transform_18(%arg0: i32, %arg1: i32) -> (i32, i32, i32) {
    %c0_i32 = arith.constant 0 : i32
    %c0_i32_0 = arith.constant 0 : i32
    %c0_i32_1 = arith.constant 0 : i32
    return %arg1, %c0_i32, %c0_i32_0 : i32, i32, i32
  }
  func.func @transform_19(%arg0: i32, %arg1: i32) -> (i32, i32, i32) {
    %c0_i32 = arith.constant 0 : i32
    %c0_i32_0 = arith.constant 0 : i32
    %c0_i32_1 = arith.constant 0 : i32
    return %arg0, %c0_i32, %c0_i32_0 : i32, i32, i32
  }
}

</mosaic_0001>

<bundles_post_ra>
// kernel: clip_ecg_tower_forward.1
= control target key start
LH: loop header
LB: loop body
LE: loop exit
PB: predicated region body
PF: predicated region fallthrough
CT: control target
= control target key end

     0   :  { %s4222_s0 = inlined_call_operand.vmem [shape: f32[2,4,200], index: 0, kind: input, shape index: {}]   ;;  %s4223_s1 = inlined_call_operand.hbm [shape: bf16[200,128], index: 1, kind: input, shape index: {}]   ;;  %s4224_s2 = inlined_call_operand.vmem [shape: f32[1,128], index: 2, kind: input, shape index: {}]   ;;  %s4225_s3 = inlined_call_operand.vmem [shape: f32[1,128], index: 3, kind: input, shape index: {}]   ;;  %s4226_s4 = inlined_call_operand.vmem [shape: f32[5,128], index: 4, kind: input, shape index: {}]   ;;  %s4227_s5 = inlined_call_operand.vmem [shape: f32[1,128], index: 5, kind: input, shape index: {}]   ;;  %s4228_s6 = inlined_call_operand.vmem [shape: f32[1,128], index: 6, kind: input, shape index: {}]   ;;  %s4229_s7 = inlined_call_operand.vmem [shape: f32[2,1,128], index: 7, kind: input, shape index: {}]   ;;  %s4230_s8 = inlined_call_operand.vmem [shape: f32[2,1,128], index: 8, kind: input, shape index: {}]   ;;  %s4231_s9 = inlined_call_operand.hbm [shape: bf16[2,128,384], index: 9, kind: input, shape index: {}]   ;;  %s4232_s10 = inlined_call_operand.vmem [shape: f32[2,1,384], index: 10, kind: input, shape index: {}]   ;;  %s4233_s11 = inlined_call_operand.vmem [shape: bf16[2,4,32,128], index: 11, kind: input, shape index: {}]   ;;  %s4234_s12 = inlined_call_operand.vmem [shape: f32[2,1,128], index: 12, kind: input, shape index: {}]   ;;  %s4235_s13 = inlined_call_operand.vmem [shape: f32[2,1,128], index: 13, kind: input, shape index: {}]   ;;  %s4236_s14 = inlined_call_operand.vmem [shape: f32[2,1,128], index: 14, kind: input, shape index: {}]   ;;  %s4237_s15 = inlined_call_operand.hbm [shape: bf16[2,128,512], index: 15, kind: input, shape index: {}]   ;;  %s4238_s16 = inlined_call_operand.vmem [shape: f32[2,1,512], index: 16, kind: input, shape index: {}]   ;;  %s4239_s17 = inlined_call_operand.hbm [shape: bf16[2,512,128], index: 17, kind: input, shape index: {}]   ;;  %s4240_s18 = inlined_call_operand.vmem [shape: f32[2,1,128], index: 18, kind: input, shape index: {}]   ;;  %s4241_s19 = inlined_call_operand.vmem [shape: f32[2,8,128], index: 19, kind: output, shape index: {}]  }
   0x1   :  { %4252 = sst [smem:[#allocation23_spill]] %s4222_s0 }
   0x2   :  { %4253 = sst [smem:[#allocation24_spill]] %s4223_s1 }
   0x3   :  { %4254 = sst [smem:[#allocation25_spill]] %s4224_s2 }
   0x4   :  { %4255 = sst [smem:[#allocation26_spill]] %s4225_s3 }
   0x5   :  { %4256 = sst [smem:[#allocation27_spill]] %s4226_s4 }
   0x6   :  { %4257 = sst [smem:[#allocation28_spill]] %s4227_s5 }
   0x7   :  { %4258 = sst [smem:[#allocation29_spill]] %s4228_s6 }
   0x8   :  { %4259 = sst [smem:[#allocation30_spill]] %s4230_s8 }
   0x9   :  { %4260 = sst [smem:[#allocation31_spill]] %s4231_s9 }
   0xa   :  { %4261 = sst [smem:[#allocation32_spill]] %s4232_s10 }
   0xb   :  { %4262 = sst [smem:[#allocation33_spill]] %s4233_s11 }
   0xc   :  { %4263 = sst [smem:[#allocation34_spill]] %s4234_s12 }
   0xd   :  { %4264 = sst [smem:[#allocation35_spill]] %s4235_s13 }
   0xe   :  { %4265 = sst [smem:[#allocation36_spill]] %s4236_s14 }
   0xf   :  { %4266 = sst [smem:[#allocation37_spill]] %s4237_s15 }
  0x10   :  { %4267 = sst [smem:[#allocation38_spill]] %s4238_s16 }
  0x11   :  { %4268 = sst [smem:[#allocation39_spill]] %s4239_s17 }
  0x12   :  { %4269 = sst [smem:[#allocation40_spill]] %s4240_s18 }
  0x13   :  { %4270 = sst [smem:[#allocation41_spill]] %s4241_s19 }
  0x14   :  { %24 = vsyncpa [#allocation6], 0 }
  0x15   :  { %25 = vsyncpa [#allocation8], 0 }
  0x16   :  { %27 = vsyncpa [#allocation8 + $0x1], 0 }
  0x17   :  { %28 = vsyncpa [#allocation11], 0 }
  0x18   :  { %30 = vsyncpa [#allocation11 + $0x1], 0  ;;  %s3698_s0 = smov 0   ;;  %s3700_s30 = smov 0  }
  0x19   :  { %s3702_s20 = smov 0   ;;  %s3704_s21 = smov 0  }
  0x1a   :  { %s3706_s1 = smov 0   ;;  %s3708_s22 = smov 0  }
  0x1b   :  { %s3710_s2 = smov 0   ;;  %s3712_s23 = smov 0  }
  0x1c LB: > { %4271 = sst [smem:[#allocation15_spill]] %s3559_s30  ;;  %s45_s24 = sadd.s32 1, %s3575_s22  ;;  %s3583_s23 = sphi %s3712_s23, %s36_s23   ;;  %s3579_s2 = sphi %s3710_s2, %s4318_s2   ;;  %s3575_s22 = sphi %s3708_s22, %s4317_s22   ;;  %s3571_s1 = sphi %s3706_s1, %s4316_s1   ;;  %s3567_s21 = sphi %s3704_s21, %s4315_s21   ;;  %s3563_s20 = sphi %s3702_s20, %s4314_s20   ;;  %s3559_s30 = sphi %s3700_s30, %s4313_s30   ;;  %s3555_s0 = sphi %s3698_s0, %s4312_s0  }
  0x1d   : > { %4272 = sst [smem:[#allocation16_spill]] %s3563_s20  ;;  %s48_s25 = sadd.s32 1, %s3579_s2 }
  0x1e   : > { %4273 = sst [smem:[#allocation17_spill]] %s3575_s22  ;;  %p46_p0 = scmp.ge.s32.totalorder %s45_s24, 2 }
  0x1f   : > { %4274 = sst [smem:[#allocation18_spill]] %s3579_s2  ;;  %s259_s3 = sadd.s32 1, %s3563_s20 }
  0x20   : > { %4275 = sst [smem:[#allocation19_spill]] %s3583_s23  ;;  %p266_p1 = scmp.ne.s32.totalorder %s3563_s20, %s3559_s30 }
  0x21   : > { %p267_p2 = scmp.eq.s32.totalorder %s3583_s23, 0  ;;  %s4320_s24 = smov (%p46_p0, %s45_s24), 0 }
  0x22   : > { %4276 = sst [smem:[#allocation20_spill]] %s4320_s24  ;;  %s4322_s25 = smov (!%p46_p0, %s48_s25), %s3579_s2 }
  0x23   : > { %s256_s26 = ssub.s32 %s3575_s22, %s4320_s24  ;;  %p268_p3 = por %p267_p2, %p266_p1 }
  0x24   : > { %p50_p4 = scmp.ge.s32.totalorder %s4322_s25, 2  ;;  %p257_p5 = scmp.eq.s32.totalorder %s256_s26, 0 }
  0x25   : > { %p3265_p6 = scmp.lt.s32.totalorder %s3583_s23, 4  ;;  %s605_s28 = sand.u32 1, %s3583_s23  }
  0x26   : > { %s4324_s25 = smov (%p50_p4, %s4322_s25), 0  ;;  %s3757_s29 = sand.u32 1, %s3563_s20  }
  0x27   : > { %4277 = sst [smem:[#allocation21_spill]] %s4324_s25  ;;  %s3236_s6 = smul.u32 192, %s3757_s29 }
  0x28   : > { %s3753_s27 = scalar_select %p257_p5, %s3563_s20, %s259_s3  }
  0x29   : > { %s3237_s2 = smul.u32 192, %s3575_s22  ;;  %p3761_p7 = pnand %p3265_p6, %p268_p3 }
  0x2a   : > { %4278 = sst [smem:[#allocation22_spill]] %s3753_s27  ;;  %s609_s27 = scalar_lea.vmem [#allocation7], %s3236_s6 }
  0x2b   : > { %s4280_s9 = sld [smem:[#allocation31_spill]]  ;;  %s617_s5 = sshll.u32 %s609_s27, 4  ;;  %s618_s5 = int_to_ptr.vmem [resolvable:$true] %s617_s5 }
  0x2c   : > { %s3768_s20 = scalar_lea.sflag [#allocation8], %s605_s28  ;;  %s3585_s19 = smov 192  }
  0x2d   : > { %s3586_s16 = smov 12   ;;  %s4248_s18 = sadd.s32 4294967295, %s3583_s23  }
  0x2e   : > { %p272_p8 = scmp.ne.s32.totalorder %s3559_s30, %s3555_s0  ;;  %p3778_p9 = scmp.eq.s32.totalorder %s4248_s18, 0 }
  0x2f   : > { %p2656_p10 = scmp.ge.s32.totalorder %s3583_s23, 1  ;;  %p543_p11 = scmp.lt.s32.totalorder %s3583_s23, 5 }
  0x30   : > { %p3786_p12 = por %p3778_p9, %p272_p8  ;;  %s3587_s0 = smov [#allocation5]  }
  0x31   : > { %s614_s3 = scalar_lea.hbm %s4280_s9, %s3237_s2  ;;  %p3790_p13 = pnand %p2656_p10, %p543_p11 }
  0x32   : > { %s615_s4 = sshll.u32 %s614_s3, 4  ;;  %s556_s27 = sshll.u32 %s3587_s0, 4  ;;  %s616_s4 = int_to_ptr.hbm [resolvable:$true] %s615_s4  ;;  %s557_s27 = int_to_ptr.vmem [resolvable:$true] %s556_s27 }
  0x33   : > { %3257 = dma.hbm_to_vmem [thread:$0]  (!%p3761_p7), %s616_s4, 3072, %s618_s5, %s3768_s20, %s3585_s19, %s3585_s19, %s3586_s16  }
  0x34   : > { %s4284_s16 = sld [smem:[#allocation24_spill]]  ;;  %p3250_p0 = pneg %p3790_p13 }
  0x35   : > { %s2660_s28 = sshll.u32 %s3757_s29, 8  ;;  %s3124_s26 = sshll.u32 %s3575_s22, 8 }
  0x36   : > { %p3251_p1 = pnand %p3250_p0, %p3778_p9  ;;  %s3588_s3 = smov 64  }
  0x37   : > { %s3589_s18 = smov 4   ;;  %s4285_s15 = sld [smem:[#allocation37_spill]] }
  0x38   : > { %s664_s5 = scalar_lea.vmem [#allocation9], %s2660_s28  ;;  %s3590_s0 = smov 256  }
  0x39   : > { %s3591_s11 = smov 16   ;;  %s4286_s17 = sld [smem:[#allocation39_spill]] }
  0x3a   : > { %s554_s19 = sshll.u32 %s4284_s16, 4  ;;  %s672_s16 = sshll.u32 %s664_s5, 4  ;;  %s555_s19 = int_to_ptr.hbm [resolvable:$true] %s554_s19  ;;  %s673_s16 = int_to_ptr.vmem [resolvable:$true] %s672_s16 }
  0x3b   : > { %3253 = dma.hbm_to_vmem [thread:$0]  (!%p3251_p1), %s555_s19, 1600, %s557_s27, [#allocation6], %s3588_s3, %s3588_s3, %s3589_s18  }
  0x3c   : > { %s693_s27 = scalar_lea.vmem [#allocation10], %s2660_s28  ;;  %s690_s9 = scalar_lea.sflag [#allocation11], %s3757_s29 }
  0x3d   : > { %s669_s4 = scalar_lea.hbm %s4285_s15, %s3124_s26  ;;  %s701_s8 = sshll.u32 %s693_s27, 4  ;;  %s702_s8 = int_to_ptr.vmem [resolvable:$true] %s701_s8 }
  0x3e   : > { %s670_s13 = sshll.u32 %s669_s4, 4  ;;  %719 = sbr.rel (%p3790_p13) target bundleno = 2321 (0x911), region = 96  ;;  %s671_s13 = int_to_ptr.hbm [resolvable:$true] %s670_s13 }
  0x3f   : > { %3260 = dma.hbm_to_vmem [thread:$0]  (!%p3761_p7), %s671_s13, 4096, %s673_s16, %s3768_s20, %s3590_s0, %s3590_s0, %s3591_s11  }
  0x40   : > { %s698_s12 = scalar_lea.hbm %s4286_s17, %s3124_s26 }
  0x41   : > { %s699_s19 = sshll.u32 %s698_s12, 4  ;;  %s700_s19 = int_to_ptr.hbm [resolvable:$true] %s699_s19 }
  0x42   : > { %3263 = dma.hbm_to_vmem [thread:$0]  (!%p3761_p7), %s700_s19, 4096, %s702_s8, %s690_s9, %s3588_s3, %s3588_s3, %s3589_s18  }
  0x43   : > { %3542 = dma.done.wait (%p3778_p9), [#allocation6], 1600  }
  0x44   : > { %3544 = vsyncadd (%p3778_p9), [#allocation6], 4294965696  ;;  %s4287_s10 = sadd.s32 4294967295, %s3583_s23   ;;  %s728_s12 = sand.u32 1, %s3559_s30  }
  0x45   : > { %s726_s11 = sand.u32 1, %s4287_s10   ;;  %s3238_s13 = smul.u32 192, %s728_s12 }
  0x46   : > { %s727_s14 = scalar_lea.sflag [#allocation8], %s726_s11 }
  0x47   : > { %s3824_s20 = scalar_lea.vmem [#allocation7], %s3238_s13 }
  0x48   : > { %3546 = dma.done.wait (%p3786_p12), %s727_s14, 7168  }
  0x49   : > { %3548 = vsyncadd (%p3786_p12), %s727_s14, 4294960128  ;;  %s2668_s8 = sshll.u32 %s728_s12, 8  ;;  %s747_s22 = scalar_lea.sflag [#allocation11], %s728_s12 }
  0x4a   : > { %s3830_s18 = scalar_lea.vmem [#allocation9], %s2668_s8  ;;  %s3832_s24 = scalar_lea.vmem [#allocation10], %s2668_s8 }
  0x4b   : > { %3550 = dma.done.wait (%p3786_p12), %s747_s22, 4096  }
  0x4c   : > { %3552 = vsyncadd (%p3786_p12), %s747_s22, 4294963200  ;;  %p851_p2 = scmp.lt.s32.totalorder %s3571_s1, 1  ;;  %p856_p3 = scmp.lt.s32.totalorder %s3567_s21, 1 }
  0x4d   : > { %s4288_s28 = sld [smem:[#allocation23_spill]]  ;;  %p2676_p4 = scmp.ne.s32.totalorder %s3567_s21, 0 }
  0x4e   : > { %s4326_s1 = smov (!%p851_p2, %s3571_s1), 1  ;;  %s4291_s22 = sld [smem:[#allocation32_spill]] }
  0x4f   : > { %s3842_s29 = scalar_select %p856_p3, %s3567_s21, 1 }
  0x50   : > { %s3126_s25 = sshll.u32 %s4326_s1, 3  ;;  %s4293_s16 = sld [smem:[#allocation35_spill]] }
  0x51   : > { %s3239_s9 = smul.u32 3, %s3842_s29  ;;  %s3127_s10 = sshll.u32 %s3842_s29, 6 }
  0x52   : > { %s4294_s17 = sld [smem:[#allocation36_spill]]  ;;  %s2674_s11 = sshll.u32 %s3842_s29, 2 }
  0x53   : > { %s855_s26 = scalar_lea.vmem %s4288_s28, %s3126_s25  ;;  %s4292_s28 = sld [smem:[#allocation33_spill]] }
  0x54   : > { %s3864_s15 = scalar_lea.vmem %s4291_s22, %s3239_s9  ;;  %s4295_s14 = sld [smem:[#allocation40_spill]] }
  0x55   : > { %s4296_s22 = sld [smem:[#allocation38_spill]] }
  0x56   : > { %s876_s0 = scalar_lea.vmem %s4293_s16, %s3842_s29  ;;  %s4297_s2 = sld [smem:[#allocation41_spill]] }
  0x57   : > { %s4298_s27 = sld [smem:[#allocation26_spill]] (!%p2676_p4) }
  0x58   : > { %s879_s30 = scalar_lea.vmem %s4294_s17, %s3842_s29  ;;  %895 = sbr.rel (%p2676_p4) target bundleno = 526 (0x20e), region = 116 }
  0x59   : > { %s3869_s3 = scalar_lea.vmem %s4292_s28, %s3127_s10  ;;  %s4299_s16 = sld [smem:[#allocation27_spill]] (!%p2676_p4) }
  0x5a   : > { %s886_s8 = scalar_lea.vmem %s4295_s14, %s3842_s29  ;;  %s4301_s9 = sld [smem:[#allocation28_spill]] (!%p2676_p4) }
  0x5b   : > { %s3887_s23 = scalar_lea.vmem %s4296_s22, %s2674_s11  ;;  %s4302_s10 = sld [smem:[#allocation29_spill]] (!%p2676_p4) }
  0x5c   : > { %s3892_s28 = scalar_lea.vmem %s4297_s2, %s3126_s25 }
  0x5d   : > { %v3135_v0 = vld [vmem:[#allocation5 + $0x38] sm:$0xff]  ;;  %v931_v1 = vld [vmem:[#allocation5 + $0x60] sm:$0xf]  ;;  %v3134_v2 = vld [vmem:[#allocation5 + $0x30] sm:$0xff]  ;;  %vm1015_vm0 = vcmask 1043456   ;;  %vm1048_vm1 = vcmask 1040384  }
  0x5e   : > { %v985_v3 = vunpack.c.l.b16 %v931_v1  ;;  %1019 = vmatpush.bf16.msra.mxu0 %v3135_v0  ;;  %v1045_v4 = vld [vmem:[%s4298_s27] sm:$0x1]  ;;  %v3139_v12 = vld [vmem:[#allocation5 + $0x58] sm:$0xff]  ;;  %v3132_v13 = vld [vmem:[#allocation5 + $0x20] sm:$0xff]  ;;  %vm1011_vm2 = vcmask 588800   ;;  %v3592_v25 = vmov 128.0  }
  0x5f   : > { %v1046_v5 = vld [vmem:[%s4299_s16] sm:$0x1]  ;;  %v3138_v14 = vld [vmem:[#allocation5 + $0x50] sm:$0xff]  ;;  %v3131_v15 = vld [vmem:[#allocation5 + $0x18] sm:$0xff]  ;;  %3347 = vrcp.f32 %v3592_v25 }
  0x60   : > { %v998_v6 = vpack.c.b16 %v985_v3, %v985_v3  ;;  %v1047_v7 = vadd.f32 %v1046_v5, %v1045_v4  ;;  %v898_v8 = vld [vmem:[%s855_s26] sm:$0xff]  ;;  %v3130_v17 = vld [vmem:[#allocation5 + $0x10] sm:$0xff]  ;;  %v3136_v18 = vld [vmem:[#allocation5 + $0x40] sm:$0xff]  ;;  %s4300_s26 = sld [smem:[#allocation25_spill]]  ;;  %v3593_v3 = vmov 0.0  }
  0x61   : > { %900 = vst [vmem:[#allocation1] ss:$2 sm:$0xff] %v898_v8  ;;  %v3133_v11 = vld [vmem:[#allocation5 + $0x28] sm:$0xff]  ;;  %v3128_v22 = vld [vmem:[#allocation5] sm:$0xff] }
  0x62   : > { %v1017_v9 = vsel %vm1015_vm0, %v998_v6, 0  ;;  %v1049_v10 = vsel %vm1048_vm1, %v1047_v7, 0.0  ;;  %1020 = vmatpush.bf16.msra.mxu0 %v3134_v2  ;;  %v3137_v16 = vld [vmem:[#allocation5 + $0x48] sm:$0xff]  ;;  %1114 = vst [vmem:[%s3892_s28 + $0x5] sm:$0x7] %v3593_v3 }
  0x63   : > { %1035 = vmatpush.bf16.msra.mxu1 %v1017_v9  ;;  %1050 = vadd.xlane.f32.xlu0 %v1049_v10  ;;  %v3129_v21 = vld [vmem:[#allocation5 + $0x8] sm:$0xff] }
  0x64   : > { %v1081_v42 = vld [vmem:[%s4299_s16 + $0x1] sm:$0xf]  ;;  %v896_v56 = vld [vmem:[%s4301_s9] sm:$0x1] }
  0x65   : > { %v3348_v26 = vpop.eup %3347  ;;  %v897_v59 = vld [vmem:[%s4302_s10] sm:$0x1] }
  0x66   : > { %1021 = vmatpush.bf16.msra.mxu0 %v3133_v11  ;;  %v1053_v27 = vmul.f32 128.0, %v3348_v26  ;;  %vm1057_vm3 = vweird.f32 %v3348_v26  ;;  %v3344_v38 = vld [vmem:[%s4300_s26] ss:$0 sm:$0xff] }
  0x67   : > { %1036 = vmatpush.bf16.msra.mxu1 %v3139_v12 }
  0x68   : > { %v902_v19 = vld.sshfl [vmem:[#allocation1 + $0x8] sm:$0xff pattern:$0x75316420]  ;;  %v901_v23 = vld.sshfl [vmem:[#allocation1] sm:$0xff pattern:$0x75316420] }
  0x69   : > { %v906_v20 = vpack.c.bf16 %v902_v19, %v902_v19  ;;  %v905_v24 = vpack.c.bf16 %v901_v23, %v901_v23  ;;  %v1054_v28 = vsub.f32 1.0, %v1053_v27 }
  0x6a   : > { %1022 = vmatpush.bf16.msra.mxu0 %v3132_v13  ;;  %v3345_v13 = vld [vmem:[%s4301_s9] ss:$0 sm:$0xff] }
  0x6b   : > { %1037 = vmatpush.bf16.msra.mxu1 %v3138_v14  ;;  %v1055_v29 = vmul.f32 %v3348_v26, %v1054_v28 }
  0x6d   : > { %v1056_v30 = vadd.f32 %v3348_v26, %v1055_v29 }
  0x6e   : > { %1023 = vmatpush.bf16.msra.mxu0 %v3131_v15 }
  0x6f   : > { %1038 = vmatpush.bf16.msra.mxu1 %v3137_v16  ;;  %v1058_v31 = vsel %vm1057_vm3, %v3348_v26, %v1056_v30  ;;  %v3346_v16 = vld [vmem:[%s4302_s10] ss:$0 sm:$0xff] }
  0x72   : > { %1024 = vmatpush.bf16.msra.mxu0 %v3130_v17 }
  0x73   : > { %1039 = vmatpush.bf16.msra.mxu1 %v3136_v18 }
  0x76   : > { %2725 = vmatmul.msk.bf16.vlgmr.msra.gmra.mxu1 %vm1011_vm2, %v906_v20  ;;  %1025 = vmatpush.bf16.msra.mxu0 %v3129_v21 }
  0x7a   : > { %1026 = vmatpush.bf16.msra.mxu0 %v3128_v22 }
  0x7d   : > { %1027 = vmatmul.bf16.vlgmr.msra.gmra.mxu0 %v905_v24 }
  0xd6   : > { %v1051_v32 = vpop.xlane.xlu0 %1050 }
  0xd7   : > { %v1059_v33 = vmul.f32 %v1058_v31, %v1051_v32 }
  0xd9   : > { %v1060_v34 = vsub.f32 %v1047_v7, %v1059_v33 }
  0xdb   : > { %v1061_v35 = vmul.f32 %v1060_v34, %v1060_v34 }
  0xdd   : > { %v1062_v36 = vsel %vm1048_vm1, %v1061_v35, 0.0 }
  0xde   : > { %1063 = vadd.xlane.f32.xlu1 %v1062_v36 }
  0xf3   : > { %v1041_v37 = vpop.f32.mrf.mxu1 }
  0xfa   : > { %v1028_v39 = vpop.f32.mrf.mxu0 }
  0xfb   : > { %v1043_v40 = vpop.f32.mrf.mxu1  ;;  %v1029_v41 = vadd.f32 %v3344_v38, %v1028_v39 }
  0xfd   : > { %v1042_v43 = vadd.f32 %v1041_v37, %v1029_v41 }
  0xff   : > { %v1082_v44 = vadd.f32 %v1081_v42, %v1042_v43 }
 0x101   : > { %v1083_v45 = vsel %vm1015_vm0, %v1082_v44, 0.0 }
 0x102   : > { %v1030_v46 = vpop.f32.mrf.mxu0  ;;  %1084 = vadd.xlane.f32.xlu0 %v1083_v45 }
 0x151   : > { %v1064_v47 = vpop.xlane.xlu1 %1063 }
 0x152   : > { %v1065_v48 = vmul.f32 %v1064_v47, %v1058_v31 }
 0x154   : > { %v1066_v49 = vadd.f32 1e-05, %v1065_v48 }
 0x156   : > { %3349 = vrsqrt.f32 %v1066_v49  ;;  %vm1073_vm4 = vweird.f32 %v1066_v49 }
 0x15c   : > { %v3350_v50 = vpop.eup %3349 }
 0x15d   : > { %v1068_v51 = vmul.f32 %v3350_v50, %v1066_v49  ;;  %vm1074_vm5 = vweird.f32 %v3350_v50 }
 0x15e   : > { %vm1075_vm6 = vmor %vm1073_vm4, %vm1074_vm5 }
 0x15f   : > { %v1069_v52 = vmul.f32 %v3350_v50, %v1068_v51 }
 0x161   : > { %v1070_v53 = vmul.f32 0.5, %v1069_v52 }
 0x163   : > { %v1071_v54 = vsub.f32 1.5, %v1070_v53 }
 0x165   : > { %v1072_v55 = vmul.f32 %v3350_v50, %v1071_v54 }
 0x167   : > { %v1076_v57 = vsel %vm1075_vm6, %v3350_v50, %v1072_v55 }
 0x168   : > { %v1077_v58 = vmul.f32 %v1076_v57, %v1060_v34 }
 0x16a   : > { %v1078_v60 = vmul.f32 %v1077_v58, %v896_v56 }
 0x16c   : > { %v1079_v61 = vadd.f32 %v1078_v60, %v897_v59 }
 0x16e   : > { %1080 = vst [vmem:[%s3892_s28] sm:$0x1] %v1079_v61 }
 0x175   : > { %v1085_v62 = vpop.xlane.xlu0 %1084 }
 0x176   : > { %v1086_v63 = vmul.f32 %v1085_v62, %v1058_v31 }
 0x178   : > { %v1087_v0 = vsub.f32 %v1082_v44, %v1086_v63 }
 0x17a   : > { %v1088_v1 = vmul.f32 %v1087_v0, %v1087_v0 }
 0x17c   : > { %v1089_v2 = vsel %vm1015_vm0, %v1088_v1, 0.0 }
 0x17d   : > { %1090 = vadd.xlane.f32.xlu1 %v1089_v2 }
 0x1f0   : > { %v1091_v4 = vpop.xlane.xlu1 %1090 }
 0x1f1   : > { %v1092_v5 = vmul.f32 %v1091_v4, %v1058_v31 }
 0x1f3   : > { %v1093_v6 = vadd.f32 1e-05, %v1092_v5 }
 0x1f5   : > { %3351 = vrsqrt.f32 %v1093_v6  ;;  %vm1100_vm8 = vweird.f32 %v1093_v6 }
 0x1fb   : > { %v3352_v7 = vpop.eup %3351 }
 0x1fc   : > { %v1095_v8 = vmul.f32 %v3352_v7, %v1093_v6  ;;  %vm1101_vm7 = vweird.f32 %v3352_v7 }
 0x1fd   : > { %vm1102_vm9 = vmor %vm1100_vm8, %vm1101_vm7 }
 0x1fe   : > { %v1096_v9 = vmul.f32 %v3352_v7, %v1095_v8 }
 0x200   : > { %v1097_v10 = vmul.f32 0.5, %v1096_v9 }
 0x202   : > { %v1098_v11 = vsub.f32 1.5, %v1097_v10 }
 0x204   : > { %v1099_v12 = vmul.f32 %v3352_v7, %v1098_v11 }
 0x206   : > { %v1103_v14 = vsel %vm1102_vm9, %v3352_v7, %v1099_v12 }
 0x207   : > { %v1104_v15 = vmul.f32 %v1103_v14, %v1087_v0 }
 0x209   : > { %v1108_v17 = vmul.f32 %v3345_v13, %v1104_v15 }
 0x20b   : > { %v1112_v18 = vadd.f32 %v3346_v16, %v1108_v17 }
 0x20d   : > { %1113 = vst [vmem:[%s3892_s28 + $0x1] sm:$0xf] %v1112_v18 }
 0x20e PF: > { %v3594_v20 = vmov 128.0   ;;  %v2812_v21 = vld [vmem:[%s3824_s20 + $0xa8] sm:$0xf]  ;;  %v3162_v22 = vld [vmem:[%s3824_s20 + $0xb0] sm:$0xf0]  ;;  %s4303_s14 = scalar_lea.vmem %s4229_s7, %s3842_s29  ;;  %s4304_s25 = sld [smem:[#allocation30_spill]] }
 0x20f   : > { %3359 = vrcp.f32 %v3594_v20  ;;  %v3161_v23 = vld [vmem:[%s3824_s20 + $0xac] sm:$0xf]  ;;  %v2813_v24 = vor.u32 %v3162_v22, %v2812_v21  ;;  %v2814_v25 = vld [vmem:[%s3824_s20 + $0xb4] sm:$0xf0]  ;;  %v2820_v26 = vld [vmem:[%s3824_s20 + $0xb0] sm:$0xf] }
 0x210   : > { %v3163_v27 = vld [vmem:[%s3824_s20 + $0xb8] sm:$0xf0]  ;;  %v2817_v28 = vor.u32 %v3161_v23, %v2814_v25  ;;  %v2800_v40 = vld [vmem:[%s3824_s20 + $0x90] sm:$0xf]  ;;  %v3158_v42 = vld [vmem:[%s3824_s20 + $0x94] sm:$0xf] }
 0x211   : > { %v2821_v29 = vor.u32 %v3163_v27, %v2820_v26  ;;  %1322 = vmatpush.bf16.msra.mxu0 %v2813_v24  ;;  %v3159_v41 = vld [vmem:[%s3824_s20 + $0x98] sm:$0xf0]  ;;  %v2802_v44 = vld [vmem:[%s3824_s20 + $0x9c] sm:$0xf0]  ;;  %v2808_v45 = vld [vmem:[%s3824_s20 + $0x98] sm:$0xf] }
 0x212   : > { %1335 = vmatpush.bf16.msra.mxu1 %v2817_v28  ;;  %v2801_v43 = vor.u32 %v3159_v41, %v2800_v40  ;;  %v3160_v46 = vld [vmem:[%s3824_s20 + $0xa0] sm:$0xf0]  ;;  %v2805_v47 = vor.u32 %v3158_v42, %v2802_v44  ;;  %v2788_v49 = vld [vmem:[%s3824_s20 + $0x78] sm:$0xf]  ;;  %v3155_v51 = vld [vmem:[%s3824_s20 + $0x7c] sm:$0xf] }
 0x213   : > { %1348 = vmatpush.bf16.msra.mxu2 %v2821_v29  ;;  %v2809_v48 = vor.u32 %v3160_v46, %v2808_v45  ;;  %v3156_v50 = vld [vmem:[%s3824_s20 + $0x80] sm:$0xf0]  ;;  %v2790_v53 = vld [vmem:[%s3824_s20 + $0x84] sm:$0xf0]  ;;  %v2796_v54 = vld [vmem:[%s3824_s20 + $0x80] sm:$0xf] }
 0x214   : > { %v3928_v19 = vld [vmem:[%s3892_s28] sm:$0xff]  ;;  %v2789_v52 = vor.u32 %v3156_v50, %v2788_v49  ;;  %v3157_v55 = vld [vmem:[%s3824_s20 + $0x88] sm:$0xf0]  ;;  %v2793_v56 = vor.u32 %v3155_v51, %v2790_v53  ;;  %v2776_v58 = vld [vmem:[%s3824_s20 + $0x60] sm:$0xf]  ;;  %s4305_s26 = scalar_lea.vmem %s4304_s25, %s3842_s29  ;;  %vm1362_vm14 = vcmask 257024  }
 0x215   : > { %1118 = vadd.xlane.f32.xlu0 %v3928_v19  ;;  %v3360_v30 = vpop.eup %3359  ;;  %1323 = vmatpush.bf16.msra.mxu0 %v2801_v43  ;;  %v2797_v57 = vor.u32 %v3157_v55, %v2796_v54  ;;  %v3153_v59 = vld [vmem:[%s3824_s20 + $0x68] sm:$0xf0]  ;;  %v3152_v60 = vld [vmem:[%s3824_s20 + $0x64] sm:$0xf]  ;;  %v2778_v62 = vld [vmem:[%s3824_s20 + $0x6c] sm:$0xf0] }
 0x216   : > { %v1121_v31 = vmul.f32 128.0, %v3360_v30  ;;  %vm1125_vm10 = vweird.f32 %v3360_v30  ;;  %1336 = vmatpush.bf16.msra.mxu1 %v2805_v47  ;;  %v2777_v61 = vor.u32 %v3153_v59, %v2776_v58  ;;  %v2784_v63 = vld [vmem:[%s3824_s20 + $0x68] sm:$0xf]  ;;  %v3154_v0 = vld [vmem:[%s3824_s20 + $0x70] sm:$0xf0]  ;;  %v2781_v1 = vor.u32 %v3152_v60, %v2778_v62  ;;  %s3595_s19 = smov 32  }
 0x217   : > { %1349 = vmatpush.bf16.msra.mxu2 %v2809_v48  ;;  %v2785_v2 = vor.u32 %v3154_v0, %v2784_v63  ;;  %v2764_v3 = vld [vmem:[%s3824_s20 + $0x48] sm:$0xf]  ;;  %v3150_v4 = vld [vmem:[%s3824_s20 + $0x50] sm:$0xf0]  ;;  %v3149_v5 = vld [vmem:[%s3824_s20 + $0x4c] sm:$0xf] }
 0x218   : > { %v1122_v32 = vsub.f32 1.0, %v1121_v31  ;;  %v2765_v6 = vor.u32 %v3150_v4, %v2764_v3  ;;  %v2766_v7 = vld [vmem:[%s3824_s20 + $0x54] sm:$0xf0]  ;;  %v2772_v8 = vld [vmem:[%s3824_s20 + $0x50] sm:$0xf]  ;;  %s3596_s11 = smov 64  }
 0x219   : > { %1324 = vmatpush.bf16.msra.mxu0 %v2789_v52  ;;  %v3151_v9 = vld [vmem:[%s3824_s20 + $0x58] sm:$0xf0]  ;;  %v2769_v10 = vor.u32 %v3149_v5, %v2766_v7  ;;  %v2752_v12 = vld [vmem:[%s3824_s20 + $0x30] sm:$0xf]  ;;  %v3146_v14 = vld [vmem:[%s3824_s20 + $0x34] sm:$0xf] }
 0x21a   : > { %v1123_v33 = vmul.f32 %v3360_v30, %v1122_v32  ;;  %1337 = vmatpush.bf16.msra.mxu1 %v2793_v56  ;;  %v2773_v11 = vor.u32 %v3151_v9, %v2772_v8  ;;  %v3147_v13 = vld [vmem:[%s3824_s20 + $0x38] sm:$0xf0]  ;;  %v2754_v16 = vld [vmem:[%s3824_s20 + $0x3c] sm:$0xf0]  ;;  %v2760_v17 = vld [vmem:[%s3824_s20 + $0x38] sm:$0xf] }
 0x21b   : > { %1350 = vmatpush.bf16.msra.mxu2 %v2797_v57  ;;  %v2753_v15 = vor.u32 %v3147_v13, %v2752_v12  ;;  %v3148_v18 = vld [vmem:[%s3824_s20 + $0x40] sm:$0xf0]  ;;  %v2757_v20 = vor.u32 %v3146_v14, %v2754_v16  ;;  %v2740_v22 = vld [vmem:[%s3824_s20 + $0x18] sm:$0xf]  ;;  %v3143_v24 = vld [vmem:[%s3824_s20 + $0x1c] sm:$0xf] }
 0x21c   : > { %v1124_v34 = vadd.f32 %v3360_v30, %v1123_v33  ;;  %v2761_v21 = vor.u32 %v3148_v18, %v2760_v17  ;;  %v3144_v23 = vld [vmem:[%s3824_s20 + $0x20] sm:$0xf0]  ;;  %v2742_v26 = vld [vmem:[%s3824_s20 + $0x24] sm:$0xf0]  ;;  %v2748_v27 = vld [vmem:[%s3824_s20 + $0x20] sm:$0xf] }
 0x21d   : > { %1325 = vmatpush.bf16.msra.mxu0 %v2777_v61  ;;  %v2741_v25 = vor.u32 %v3144_v23, %v2740_v22  ;;  %v3145_v28 = vld [vmem:[%s3824_s20 + $0x28] sm:$0xf0]  ;;  %v2745_v29 = vor.u32 %v3143_v24, %v2742_v26  ;;  %v2728_v31 = vld [vmem:[%s3824_s20] sm:$0xf]  ;;  %v3140_v33 = vld [vmem:[%s3824_s20 + $0x4] sm:$0xf] }
 0x21e   : > { %v3937_v35 = vsel %vm1125_vm10, %v3360_v30, %v1124_v34  ;;  %1338 = vmatpush.bf16.msra.mxu1 %v2781_v1  ;;  %v2749_v30 = vor.u32 %v3145_v28, %v2748_v27  ;;  %v3141_v32 = vld [vmem:[%s3824_s20 + $0x8] sm:$0xf0]  ;;  %v3353_v51 = vld [vmem:[%s4303_s14] ss:$0 sm:$0xff]  ;;  %vm1428_vm15 = vcmask 261120   ;;  %vm1566_vm0 = vcmask 1043456  }
 0x21f   : > { %1351 = vmatpush.bf16.msra.mxu2 %v2785_v2  ;;  %v2729_v34 = vor.u32 %v3141_v32, %v2728_v31  ;;  %v3354_v54 = vld [vmem:[%s4305_s26] ss:$0 sm:$0xff]  ;;  %v1505_v28 = vlaneseq  ;;  %vm1514_vm2 = vcmask 64512   ;;  %s4306_s13 = sld [smem:[#allocation34_spill]] }
 0x220   : > { %v1186_v58 = vld [vmem:[%s3864_s15] sm:$0x7]  ;;  %s3597_s15 = smov 96  }
 0x221   : > { %1326 = vmatpush.bf16.msra.mxu0 %v2765_v6  ;;  %v1188_v59 = vperm.slane %v1186_v58, 0  ;;  %v1189_v60 = vperm.slane %v1186_v58, 1  ;;  %v1190_v2 = vperm.slane %v1186_v58, 2 }
 0x222   : > { %1339 = vmatpush.bf16.msra.mxu1 %v2769_v10 }
 0x223   : > { %1352 = vmatpush.bf16.msra.mxu2 %v2773_v11 }
 0x225   : > { %1327 = vmatpush.bf16.msra.mxu0 %v2753_v15  ;;  %s4307_s1 = scalar_lea.vmem %s4306_s13, %s3842_s29 }
 0x226   : > { %1340 = vmatpush.bf16.msra.mxu1 %v2757_v20 }
 0x227   : > { %1353 = vmatpush.bf16.msra.mxu2 %v2761_v21 }
 0x229   : > { %1328 = vmatpush.bf16.msra.mxu0 %v2741_v25 }
 0x22a   : > { %1341 = vmatpush.bf16.msra.mxu1 %v2745_v29 }
 0x22b   : > { %1354 = vmatpush.bf16.msra.mxu2 %v2749_v30  ;;  %v1506_v30 = vand.u32 127, %v1505_v28 }
 0x22d   : > { %1329 = vmatpush.bf16.msra.mxu0 %v2729_v34  ;;  %vm1507_vm1 = vcmp.lt.s32.totalorder %v1506_v30, 5 }
 0x288   : > { %v1119_v36 = vpop.xlane.xlu0 %1118 }
 0x289   : > { %v1127_v37 = vmul.f32 %v3937_v35, %v1119_v36  ;;  %v2730_v36 = vld [vmem:[%s3824_s20 + $0xc] sm:$0xf0] }
 0x28a   : > { %v2733_v40 = vor.u32 %v3140_v33, %v2730_v36 }
 0x28b   : > { %v3941_v38 = vsub.f32 %v3928_v19, %v1127_v37  ;;  %v2736_v37 = vld [vmem:[%s3824_s20 + $0x8] sm:$0xf] }
 0x28c   : > { %1342 = vmatpush.bf16.msra.mxu1 %v2733_v40 }
 0x28d   : > { %v1129_v39 = vmul.f32 %v3941_v38, %v3941_v38 }
 0x28f   : > { %1130 = vadd.xlane.f32.xlu0 %v1129_v39  ;;  %v3142_v39 = vld [vmem:[%s3824_s20 + $0x10] sm:$0xf0] }
 0x290   : > { %v2737_v41 = vor.u32 %v3142_v39, %v2736_v37 }
 0x292   : > { %1355 = vmatpush.bf16.msra.mxu2 %v2737_v41 }
 0x302   : > { %v1131_v42 = vpop.xlane.xlu0 %1130 }
 0x303   : > { %v1132_v43 = vmul.f32 %v1131_v42, %v3937_v35 }
 0x305   : > { %v1133_v44 = vadd.f32 1e-05, %v1132_v43 }
 0x307   : > { %3361 = vrsqrt.f32 %v1133_v44  ;;  %vm1140_vm12 = vweird.f32 %v1133_v44 }
 0x30d   : > { %v3362_v45 = vpop.eup %3361 }
 0x30e   : > { %v1135_v46 = vmul.f32 %v3362_v45, %v1133_v44  ;;  %vm1141_vm11 = vweird.f32 %v3362_v45 }
 0x30f   : > { %vm1142_vm13 = vmor %vm1140_vm12, %vm1141_vm11 }
 0x310   : > { %v1136_v47 = vmul.f32 %v3362_v45, %v1135_v46 }
 0x312   : > { %v1137_v48 = vmul.f32 0.5, %v1136_v47 }
 0x314   : > { %v1138_v49 = vsub.f32 1.5, %v1137_v48 }
 0x316   : > { %v1139_v50 = vmul.f32 %v3362_v45, %v1138_v49 }
 0x318   : > { %v1143_v52 = vsel %vm1142_vm13, %v3362_v45, %v1139_v50 }
 0x319   : > { %v1144_v53 = vmul.f32 %v1143_v52, %v3941_v38 }
 0x31b   : > { %v1148_v55 = vmul.f32 %v3353_v51, %v1144_v53 }
 0x31d   : > { %v1152_v56 = vadd.f32 %v3354_v54, %v1148_v55 }
 0x31f   : > { %v1153_v57 = vpack.c.bf16 %v1152_v56, %v1152_v56 }
 0x321   : > { %1330 = vmatmul.bf16.vlgmr.msra.gmra.mxu0 %v1153_v57  ;;  %1343 = vmatmul.bf16.vlgmr.msra.gmra.mxu1 %v1153_v57 }
 0x322   : > { %1356 = vmatmul.bf16.vlgmr.msra.gmra.mxu2 %v1153_v57 }
 0x39e   : > { %v1331_v61 = vpop.f32.mrf.mxu0  ;;  %v1344_v62 = vpop.f32.mrf.mxu1 }
 0x39f   : > { %v1332_v63 = vadd.f32 %v1331_v61, %v1188_v59  ;;  %v1345_v0 = vadd.f32 %v1344_v62, %v1189_v60 }
 0x3a1   : > { %v1361_v38 = vpack.c.bf16 %v1332_v63, %v1332_v63  ;;  %v1364_v1 = vpack.c.bf16 %v1345_v0, %v1345_v0 }
 0x3a3   : > { %1363 = vst.msk [vmem:[#allocation2] sm:$0xf] %vm1362_vm14, %v1361_v38  ;;  %1406 = vrot.lane.b32.xlu0 %v1364_v1, %s3595_s19  ;;  %1391 = vrot.lane.b32.xlu2 %v1364_v1, %s3596_s11 }
 0x3a4   : > { %1365 = vst.msk [vmem:[#allocation3] sm:$0xf] %vm1362_vm14, %v1364_v1  ;;  %1375 = vrot.lane.b32.xlu1 %v1364_v1, %s3597_s15 }
 0x3a5   : > { %v1357_v3 = vpop.f32.mrf.mxu2 }
 0x3a6   : > { %v1358_v4 = vadd.f32 %v1357_v3, %v1190_v2  ;;  %v1333_v5 = vpop.f32.mrf.mxu0  ;;  %v1346_v6 = vpop.f32.mrf.mxu1 }
 0x3a8   : > { %v4005_v7 = vpack.c.bf16 %v1358_v4, %v1358_v4 }
 0x3aa   : > { %1367 = vst.msk [vmem:[#allocation4] sm:$0xf] %vm1362_vm14, %v4005_v7  ;;  %v1416_v13 = vld [vmem:[#allocation2] sm:$0xf] }
 0x3ab   : > { %1386 = vrot.lane.b32.xlu2 %v1361_v38, %s3596_s11  ;;  %v1420_v8 = vld [vmem:[#allocation3] sm:$0xf] }
 0x3ac   : > { %1369 = vrot.lane.b32.xlu1 %v1361_v38, %s3597_s15  ;;  %v1433_v9 = vsel %vm1428_vm15, %v1420_v8, 0 }
 0x3ad   : > { %v1359_v10 = vpop.f32.mrf.mxu2  ;;  %1442 = vmatpush.bf16.xpose.msra.mxu3 %v1433_v9 }
 0x3b1   : > { %v1424_v11 = vld [vmem:[#allocation4] sm:$0xf] }
 0x3b2   : > { %v1568_v12 = vsel %vm1566_vm0, %v1424_v11, 0 }
 0x3b3   : > { %1577 = vmatpush.bf16.msrb.mxu1 %v1568_v12 }
 0x3b4   : > { %1401 = vrot.lane.b32.xlu1 %v1361_v38, %s3595_s19  ;;  %2822 = vmatmul.msk.bf16.vlgmr.msra.gmra.mxu3 %vm1428_vm15, %v1416_v13 }
 0x3fd   : > { %v1392_v14 = vpop.permute.xlu2 %1391 }
 0x3fe   : > { %1395 = vst.msk [vmem:[#allocation3 + $0x8] sm:$0xf] %vm1362_vm14, %v1392_v14 }
 0x405   : > { %v1387_v15 = vpop.permute.xlu2 %1386  ;;  %v1422_v20 = vld [vmem:[#allocation3 + $0x8] sm:$0xf] }
 0x406   : > { %1390 = vst.msk [vmem:[#allocation2 + $0x8] sm:$0xf] %vm1362_vm14, %v1387_v15  ;;  %v1471_v25 = vsel %vm1428_vm15, %v1422_v20, 0 }
 0x40d   : > { %v1418_v31 = vld [vmem:[#allocation2 + $0x8] sm:$0xf] }
 0x415   : > { %v1407_v16 = vpop.permute.xlu0 %1406 }
 0x416   : > { %1410 = vst.msk [vmem:[#allocation3 + $0xc] sm:$0xf] %vm1362_vm14, %v1407_v16  ;;  %v1376_v17 = vpop.permute.xlu1 %1375  ;;  %v3167_v16 = vld [vmem:[%s3869_s3 + $0x18] sm:$0xff] }
 0x417   : > { %1379 = vst.msk [vmem:[#allocation3 + $0x4] sm:$0xf] %vm1362_vm14, %v1376_v17 }
 0x41d   : > { %v1423_v18 = vld [vmem:[#allocation3 + $0xc] sm:$0xf] }
 0x41e   : > { %v1370_v21 = vpop.permute.xlu1 %1369  ;;  %v1421_v22 = vld [vmem:[#allocation3 + $0x4] sm:$0xf]  ;;  %v1490_v23 = vsel %vm1428_vm15, %v1423_v18, 0 }
 0x41f   : > { %1373 = vst.msk [vmem:[#allocation2 + $0x4] sm:$0xf] %vm1362_vm14, %v1370_v21  ;;  %v1452_v24 = vsel %vm1428_vm15, %v1421_v22, 0  ;;  %1499 = vmatpush.bf16.xpose.msrb.mxu0 %v1490_v23 }
 0x420   : > { %1461 = vmatpush.bf16.xpose.msrb.mxu3 %v1452_v24 }
 0x426   : > { %v1402_v26 = vpop.permute.xlu1 %1401  ;;  %v1417_v27 = vld [vmem:[#allocation2 + $0x4] sm:$0xf] }
 0x427   : > { %1405 = vst.msk [vmem:[#allocation2 + $0xc] sm:$0xf] %vm1362_vm14, %v1402_v26  ;;  %2823 = vmatmul.msk.bf16.vlgmr.msrb.gmra.mxu3 %vm1428_vm15, %v1417_v27 }
 0x428   : > { %1480 = vmatpush.bf16.xpose.msra.mxu3 %v1471_v25 }
 0x42e   : > { %v1419_v29 = vld [vmem:[#allocation2 + $0xc] sm:$0xf] }
 0x42f   : > { %2825 = vmatmul.msk.bf16.vlgmr.msrb.gmra.mxu0 %vm1428_vm15, %v1419_v29 }
 0x437   : > { %v1444_v32 = vpop.f32.mrf.mxu3  ;;  %2824 = vmatmul.msk.bf16.vlgmr.msra.gmra.mxu3 %vm1428_vm15, %v1418_v31 }
 0x438   : > { %v1510_v33 = vsel %vm1507_vm1, %v1444_v32, -1e+30  ;;  %v3166_v32 = vld [vmem:[%s3869_s3 + $0x10] sm:$0xff] }
 0x439   : > { %v1515_v34 = vsel %vm1514_vm2, %v1510_v33, -inf }
 0x43a   : > { %1516 = vmax.xlane.f32.xlu0 %v1515_v34  ;;  %v3164_v34 = vld [vmem:[%s3869_s3] sm:$0xff] }
 0x43f   : > { %v1446_v36 = vpop.f32.mrf.mxu3 }
 0x440   : > { %v3169_v36 = vld [vmem:[%s3869_s3 + $0x28] sm:$0xff] }
 0x4aa   : > { %v1463_v37 = vpop.f32.mrf.mxu3 }
 0x4ab   : > { %v1511_v39 = vsel %vm1507_vm1, %v1463_v37, -1e+30  ;;  %v3171_v37 = vld [vmem:[%s3869_s3 + $0x38] sm:$0xff] }
 0x4ac   : > { %v1501_v40 = vpop.f32.mrf.mxu0  ;;  %v1518_v41 = vsel %vm1514_vm2, %v1511_v39, -inf }
 0x4ad   : > { %1519 = vmax.xlane.f32.xlu2 %v1518_v41  ;;  %v1513_v42 = vsel %vm1507_vm1, %v1501_v40, -1e+30  ;;  %v1517_v56 = vpop.xlane.xlu0 %1516  ;;  %v3170_v40 = vld [vmem:[%s3869_s3 + $0x30] sm:$0xff] }
 0x4ae   : > { %v1524_v45 = vsel %vm1514_vm2, %v1513_v42, -inf  ;;  %v1527_v60 = vsub.f32 %v1510_v33, %v1517_v56  ;;  %v3165_v33 = vld [vmem:[%s3869_s3 + $0x8] sm:$0xff] }
 0x4af   : > { %1681 = vmatpush.bf16.msra.mxu1 %v3165_v33 }
 0x4b0   : > { %v1531_v62 = vmul.f32 1.442695, %v1527_v60 }
 0x4b2   : > { %v1465_v43 = vpop.f32.mrf.mxu3 }
 0x4b3   : > { %1682 = vmatpush.bf16.msra.mxu1 %v3164_v34  ;;  %v2950_v34 = vld [vmem:[%s3830_s18 + $0xb0] sm:$0xf0] }
 0x4b4   : > { %v1503_v44 = vpop.f32.mrf.mxu0 }
 0x4b5   : > { %1525 = vmax.xlane.f32.xlu2 %v1524_v45 }
 0x4ba   : > { %v1482_v46 = vpop.f32.mrf.mxu3 }
 0x4bb   : > { %v1512_v47 = vsel %vm1507_vm1, %v1482_v46, -1e+30 }
 0x4bc   : > { %v1521_v48 = vsel %vm1514_vm2, %v1512_v47, -inf }
 0x4bd   : > { %1522 = vmax.xlane.f32.xlu1 %v1521_v48 }
 0x4c2   : > { %v1484_v49 = vpop.f32.mrf.mxu3 }
 0x4cd   : > { %1381 = vrot.lane.b32.xlu2 %v4005_v7, %s3597_s15 }
 0x4d5   : > { %1411 = vrot.lane.b32.xlu2 %v4005_v7, %s3595_s19 }
 0x520   : > { %v1520_v50 = vpop.xlane.xlu2 %1519 }
 0x521   : > { %v1528_v51 = vsub.f32 %v1511_v39, %v1520_v50  ;;  %v3168_v39 = vld [vmem:[%s3869_s3 + $0x20] sm:$0xff] }
 0x523   : > { %v1533_v52 = vmul.f32 1.442695, %v1528_v51 }
 0x525   : > { %3363 = vpow2.f32 %v1533_v52 }
 0x528   : > { %v1526_v53 = vpop.xlane.xlu2 %1525 }
 0x529   : > { %v1530_v2 = vsub.f32 %v1513_v42, %v1526_v53 }
 0x52b   : > { %v3364_v54 = vpop.eup %3363  ;;  %v1537_v4 = vmul.f32 1.442695, %v1530_v2  ;;  %v2980_v2 = vld [vmem:[%s3830_s18 + $0xe0] sm:$0xf] }
 0x52c   : > { %v1542_v55 = vsel %vm1514_vm2, %v3364_v54, 0.0 }
 0x52d   : > { %1543 = vadd.xlane.f32.xlu1 %v1542_v55 }
 0x530   : > { %v1382_v57 = vpop.permute.xlu2 %1381  ;;  %v1523_v58 = vpop.xlane.xlu1 %1522 }
 0x531   : > { %1385 = vst.msk [vmem:[#allocation4 + $0x4] sm:$0xf] %vm1362_vm14, %v1382_v57  ;;  %v1529_v59 = vsub.f32 %v1512_v47, %v1523_v58 }
 0x533   : > { %v1535_v61 = vmul.f32 1.442695, %v1529_v59 }
 0x535   : > { %3365 = vpow2.f32 %v1535_v61 }
 0x536   : > { %3367 = vpow2.f32 %v1531_v62 }
 0x537   : > { %3369 = vpow2.f32 %v1537_v4  ;;  %v3200_v4 = vld [vmem:[%s3830_s18 + $0xe4] sm:$0xf] }
 0x538   : > { %v1412_v63 = vpop.permute.xlu2 %1411  ;;  %v1425_v0 = vld [vmem:[#allocation4 + $0x4] sm:$0xf] }
 0x539   : > { %1415 = vst.msk [vmem:[#allocation4 + $0xc] sm:$0xf] %vm1362_vm14, %v1412_v63  ;;  %v1587_v38 = vsel %vm1566_vm0, %v1425_v0, 0  ;;  %v3355_v63 = vld [vmem:[%s4307_s1] ss:$0 sm:$0xff] }
 0x53a   : > { %1596 = vmatpush.bf16.msrb.mxu2 %v1587_v38 }
 0x53b   : > { %v3366_v1 = vpop.eup %3365 }
 0x53c   : > { %v1545_v3 = vsel %vm1514_vm2, %v3366_v1, 0.0  ;;  %v3368_v6 = vpop.eup %3367 }
 0x53d   : > { %1546 = vadd.xlane.f32.xlu0 %v1545_v3  ;;  %v1539_v9 = vsel %vm1514_vm2, %v3368_v6, 0.0  ;;  %v3370_v10 = vpop.eup %3369  ;;  %v3202_v3 = vld [vmem:[%s3830_s18 + $0xec] sm:$0xf0] }
 0x53e   : > { %v1548_v11 = vsel %vm1514_vm2, %v3370_v10, 0.0  ;;  %1709 = vmatpush.bf16.msra.mxu2 %v3167_v16 }
 0x540   : > { %v1427_v5 = vld [vmem:[#allocation4 + $0xc] sm:$0xf] }
 0x541   : > { %v1625_v8 = vsel %vm1566_vm0, %v1427_v5, 0  ;;  %v2981_v5 = vor.u32 %v3202_v3, %v2980_v2  ;;  %v2926_v2 = vld [vmem:[%s3830_s18 + $0x78] sm:$0xf0] }
 0x542   : > { %1634 = vmatpush.bf16.msra.mxu0 %v1625_v8  ;;  %1710 = vmatpush.bf16.msra.mxu2 %v3166_v32  ;;  %v2988_v8 = vld [vmem:[%s3830_s18 + $0xe8] sm:$0xf]  ;;  %v3192_v32 = vld [vmem:[%s3830_s18 + $0xa4] sm:$0xf] }
 0x545   : > { %1540 = vadd.xlane.f32.xlu0 %v1539_v9  ;;  %v3203_v9 = vld [vmem:[%s3830_s18 + $0xf4] sm:$0xf0] }
 0x546   : > { %1396 = vrot.lane.b32.xlu1 %v4005_v7, %s3596_s11  ;;  %1765 = vmatpush.bf16.msrb.mxu0 %v3171_v37  ;;  %v3195_v37 = vld [vmem:[%s3830_s18 + $0xb4] sm:$0xf0] }
 0x54a   : > { %1766 = vmatpush.bf16.msrb.mxu0 %v3170_v40 }
 0x54d   : > { %1549 = vadd.xlane.f32.xlu0 %v1548_v11  ;;  %v2989_v11 = vor.u32 %v3203_v9, %v2988_v8  ;;  %v2902_v9 = vld [vmem:[%s3830_s18 + $0x50] sm:$0xf0] }
 0x5a0   : > { %v1544_v12 = vpop.xlane.xlu1 %1543 }
 0x5a1   : > { %3371 = vrcp.f32 %v1544_v12  ;;  %v3201_v12 = vld [vmem:[%s3830_s18 + $0xec] sm:$0xf] }
 0x5a7   : > { %v3372_v13 = vpop.eup %3371 }
 0x5a8   : > { %v1556_v14 = vmul.f32 %v3372_v13, %v3364_v54 }
 0x5aa   : > { %v1560_v15 = vpack.c.bf16 %v1556_v14, %v1556_v14 }
 0x5ac   : > { %2827 = vmatmul.msk.bf16.vlgmr.msrb.gmra.mxu2 %vm1514_vm2, %v1560_v15 }
 0x5b0   : > { %v1547_v17 = vpop.xlane.xlu0 %1546 }
 0x5b1   : > { %3373 = vrcp.f32 %v1547_v17 }
 0x5b7   : > { %v3374_v7 = vpop.eup %3373 }
 0x5b8   : > { %v1541_v18 = vpop.xlane.xlu0 %1540  ;;  %v1397_v20 = vpop.permute.xlu1 %1396  ;;  %v1557_v22 = vmul.f32 %v3374_v7, %v3366_v1  ;;  %v3196_v7 = vld [vmem:[%s3830_s18 + $0xc4] sm:$0xf] }
 0x5b9   : > { %3375 = vrcp.f32 %v1541_v18  ;;  %1400 = vst.msk [vmem:[#allocation4 + $0x8] sm:$0xf] %vm1362_vm14, %v1397_v20  ;;  %v2964_v18 = vld [vmem:[%s3830_s18 + $0xc0] sm:$0xf]  ;;  %v3198_v20 = vld [vmem:[%s3830_s18 + $0xcc] sm:$0xf0] }
 0x5ba   : > { %v1561_v28 = vpack.c.bf16 %v1557_v22, %v1557_v22  ;;  %v2966_v22 = vld [vmem:[%s3830_s18 + $0xd0] sm:$0xf0] }
 0x5bf   : > { %v3376_v21 = vpop.eup %3375 }
 0x5c0   : > { %v1555_v23 = vmul.f32 %v3376_v21, %v3368_v6  ;;  %v1550_v24 = vpop.xlane.xlu0 %1549  ;;  %v1426_v25 = vld [vmem:[#allocation4 + $0x8] sm:$0xf]  ;;  %v2965_v21 = vor.u32 %v3198_v20, %v2964_v18  ;;  %v3178_v18 = vld [vmem:[%s3830_s18 + $0x2c] sm:$0xf0]  ;;  %v3176_v20 = vld [vmem:[%s3830_s18 + $0x24] sm:$0xf] }
 0x5c1   : > { %3377 = vrcp.f32 %v1550_v24  ;;  %v1606_v26 = vsel %vm1566_vm0, %v1426_v25, 0  ;;  %v2982_v6 = vld [vmem:[%s3830_s18 + $0xf0] sm:$0xf0]  ;;  %v3199_v24 = vld [vmem:[%s3830_s18 + $0xd4] sm:$0xf0]  ;;  %v2969_v25 = vor.u32 %v3196_v7, %v2966_v22 }
 0x5c2   : > { %1615 = vmatpush.bf16.msrb.mxu3 %v1606_v26  ;;  %v1559_v27 = vpack.c.bf16 %v1555_v23, %v1555_v23  ;;  %v2972_v23 = vld [vmem:[%s3830_s18 + $0xc8] sm:$0xf] }
 0x5c3   : > { %v2973_v26 = vor.u32 %v3199_v24, %v2972_v23  ;;  %v2892_v22 = vld [vmem:[%s3830_s18 + $0x28] sm:$0xf]  ;;  %v3179_v23 = vld [vmem:[%s3830_s18 + $0x34] sm:$0xf0] }
 0x5c4   : > { %2826 = vmatmul.msk.bf16.vlgmr.msrb.gmra.mxu1 %vm1514_vm2, %v1559_v27  ;;  %v3197_v27 = vld [vmem:[%s3830_s18 + $0xcc] sm:$0xf] }
 0x5c5   : > { %2828 = vmatmul.msk.bf16.vlgmr.msrb.gmra.mxu3 %vm1514_vm2, %v1561_v28  ;;  %2014 = vmatpush.bf16.msrb.mxu1 %v2981_v5  ;;  %v2974_v28 = vld [vmem:[%s3830_s18 + $0xd8] sm:$0xf0]  ;;  %v3182_v5 = vld [vmem:[%s3830_s18 + $0x4c] sm:$0xf0] }
 0x5c6   : > { %1737 = vmatpush.bf16.msra.mxu3 %v3169_v36  ;;  %v2956_v36 = vld [vmem:[%s3830_s18 + $0xa8] sm:$0xf] }
 0x5c7   : > { %v3378_v29 = vpop.eup %3377  ;;  %v2957_v40 = vor.u32 %v3195_v37, %v2956_v36  ;;  %v2876_v36 = vld [vmem:[%s3830_s18 + $0x8] sm:$0xf]  ;;  %v3175_v37 = vld [vmem:[%s3830_s18 + $0x14] sm:$0xf0] }
 0x5c8   : > { %v1558_v30 = vmul.f32 %v3378_v29, %v3370_v10  ;;  %v2985_v10 = vor.u32 %v3200_v4, %v2982_v6  ;;  %v2977_v29 = vor.u32 %v3197_v27, %v2974_v28  ;;  %v2900_v4 = vld [vmem:[%s3830_s18 + $0x40] sm:$0xf]  ;;  %v3180_v6 = vld [vmem:[%s3830_s18 + $0x44] sm:$0xf]  ;;  %v2894_v27 = vld [vmem:[%s3830_s18 + $0x38] sm:$0xf0] }
 0x5c9   : > { %2015 = vmatpush.bf16.msrb.mxu1 %v2965_v21  ;;  %v2901_v8 = vor.u32 %v3182_v5, %v2900_v4  ;;  %v2886_v21 = vld [vmem:[%s3830_s18 + $0x30] sm:$0xf0]  ;;  %v2868_v28 = vld [vmem:[%s3830_s18] sm:$0xf]  ;;  %v3217_v5 = vld [vmem:[%s3832_s24 + $0x68] sm:$0xff] }
 0x5ca   : > { %v1562_v31 = vpack.c.bf16 %v1558_v30, %v1558_v30  ;;  %1738 = vmatpush.bf16.msra.mxu3 %v3168_v39  ;;  %2027 = vmatpush.bf16.msrb.mxu2 %v2985_v10  ;;  %v2948_v30 = vld [vmem:[%s3830_s18 + $0xa0] sm:$0xf]  ;;  %v2953_v39 = vor.u32 %v3192_v32, %v2950_v34  ;;  %v2908_v10 = vld [vmem:[%s3830_s18 + $0x48] sm:$0xf]  ;;  %v2889_v24 = vor.u32 %v3176_v20, %v2886_v21  ;;  %v2870_v32 = vld [vmem:[%s3830_s18 + $0x10] sm:$0xf0] }
 0x5cb   : > { %v3232_v4 = vld [vmem:[%s3832_s24 + $0xe0] sm:$0xff]  ;;  %v3222_v20 = vld [vmem:[%s3832_s24 + $0x90] sm:$0xff] }
 0x5cc   : > { %2829 = vmatmul.msk.bf16.vlgmr.msra.gmra.mxu0 %vm1514_vm2, %v1562_v31  ;;  %v3194_v31 = vld [vmem:[%s3830_s18 + $0xac] sm:$0xf0]  ;;  %v3228_v21 = vld [vmem:[%s3832_s24 + $0xc0] sm:$0xff] }
 0x5cd   : > { %v2949_v33 = vor.u32 %v3194_v31, %v2948_v30  ;;  %v3174_v30 = vld [vmem:[%s3830_s18 + $0xc] sm:$0xf0]  ;;  %v3172_v31 = vld [vmem:[%s3830_s18 + $0x4] sm:$0xf] }
 0x5ce   : > { %2040 = vmatpush.bf16.msrb.mxu3 %v2989_v11  ;;  %2028 = vmatpush.bf16.msrb.mxu2 %v2969_v25  ;;  %v3183_v11 = vld [vmem:[%s3830_s18 + $0x54] sm:$0xf0]  ;;  %v2893_v25 = vor.u32 %v3179_v23, %v2892_v22  ;;  %v2873_v34 = vor.u32 %v3172_v31, %v2870_v32  ;;  %v3213_v22 = vld [vmem:[%s3832_s24 + $0x48] sm:$0xff] }
 0x5cf   : > { %2016 = vmatpush.bf16.msrb.mxu1 %v2949_v33  ;;  %v2869_v33 = vor.u32 %v3174_v30, %v2868_v28  ;;  %v3221_v23 = vld [vmem:[%s3832_s24 + $0x88] sm:$0xff] }
 0x5d2   : > { %2041 = vmatpush.bf16.msrb.mxu3 %v2973_v26  ;;  %2029 = vmatpush.bf16.msrb.mxu2 %v2953_v39  ;;  %v3177_v26 = vld [vmem:[%s3830_s18 + $0x2c] sm:$0xf] }
 0x5d3   : > { %v3173_v39 = vld [vmem:[%s3830_s18 + $0xc] sm:$0xf] }
 0x5d6   : > { %2042 = vmatpush.bf16.msrb.mxu3 %v2957_v40  ;;  %v2877_v40 = vor.u32 %v3175_v37, %v2876_v36 }
 0x62f   : > { %v1598_v41 = vpop.f32.mrf.mxu2 }
 0x630   : > { %v1641_v42 = vpack.c.bf16 %v1598_v41, %v1598_v41  ;;  %v3193_v41 = vld [vmem:[%s3830_s18 + $0xac] sm:$0xf] }
 0x632   : > { %2847 = vmatmul.msk.bf16.vlgmr.msra.gmra.mxu2 %vm1428_vm15, %v1641_v42  ;;  %v2958_v42 = vld [vmem:[%s3830_s18 + $0xb8] sm:$0xf0] }
 0x637   : > { %v1600_v43 = vpop.f32.mrf.mxu2 }
 0x638   : > { %v2961_v43 = vor.u32 %v3193_v41, %v2958_v42  ;;  %v2878_v41 = vld [vmem:[%s3830_s18 + $0x18] sm:$0xf0] }
 0x639   : > { %v2881_v42 = vor.u32 %v3173_v39, %v2878_v41 }
 0x641   : > { %v1579_v44 = vpop.f32.mrf.mxu1 }
 0x642   : > { %v1640_v45 = vpack.c.bf16 %v1579_v44, %v1579_v44  ;;  %v2932_v44 = vld [vmem:[%s3830_s18 + $0x80] sm:$0xf] }
 0x644   : > { %2838 = vmatmul.msk.bf16.vlgmr.msra.gmra.mxu1 %vm1428_vm15, %v1640_v45  ;;  %v3190_v45 = vld [vmem:[%s3830_s18 + $0x8c] sm:$0xf0] }
 0x648   : > { %v1617_v46 = vpop.f32.mrf.mxu3 }
 0x649   : > { %v1642_v47 = vpack.c.bf16 %v1617_v46, %v1617_v46  ;;  %v1581_v48 = vpop.f32.mrf.mxu1  ;;  %v1636_v49 = vpop.f32.mrf.mxu0  ;;  %v3188_v46 = vld [vmem:[%s3830_s18 + $0x84] sm:$0xf] }
 0x64a   : > { %v1643_v50 = vpack.c.bf16 %v1636_v49, %v1636_v49  ;;  %v2934_v48 = vld [vmem:[%s3830_s18 + $0x90] sm:$0xf0]  ;;  %v2940_v49 = vld [vmem:[%s3830_s18 + $0x88] sm:$0xf] }
 0x64b   : > { %2856 = vmatmul.msk.bf16.vlgmr.msra.gmra.mxu3 %vm1428_vm15, %v1642_v47  ;;  %v2933_v47 = vor.u32 %v3190_v45, %v2932_v44  ;;  %v3211_v44 = vld [vmem:[%s3832_s24 + $0x38] sm:$0xff] }
 0x64c   : > { %2865 = vmatmul.msk.bf16.vlgmr.msrb.gmra.mxu0 %vm1428_vm15, %v1643_v50  ;;  %v3191_v50 = vld [vmem:[%s3830_s18 + $0x94] sm:$0xf0] }
 0x64d   : > { %2017 = vmatpush.bf16.msrb.mxu1 %v2933_v47  ;;  %v3235_v45 = vld [vmem:[%s3832_s24 + $0xf8] sm:$0xff] }
 0x650   : > { %v1619_v51 = vpop.f32.mrf.mxu3 }
 0x651   : > { %v1638_v52 = vpop.f32.mrf.mxu0  ;;  %v2937_v51 = vor.u32 %v3188_v46, %v2934_v48 }
 0x652   : > { %v2941_v52 = vor.u32 %v3191_v50, %v2940_v49 }
 0x653   : > { %2030 = vmatpush.bf16.msrb.mxu2 %v2937_v51 }
 0x654   : > { %2043 = vmatpush.bf16.msrb.mxu3 %v2941_v52 }
 0x6b5   : > { %v1712_v53 = vpop.f32.mrf.mxu2 }
 0x6bd   : > { %v1714_v54 = vpop.f32.mrf.mxu2 }
 0x6be   : > { %v2942_v54 = vld [vmem:[%s3830_s18 + $0x98] sm:$0xf0] }
 0x6c1   : > { %v1684_v55 = vpop.f32.mrf.mxu1 }
 0x6c2   : > { %v1772_v58 = vadd.f32 %v1712_v53, %v1684_v55  ;;  %v3189_v53 = vld [vmem:[%s3830_s18 + $0x8c] sm:$0xf] }
 0x6c3   : > { %v2945_v55 = vor.u32 %v3189_v53, %v2942_v54 }
 0x6c9   : > { %v1686_v56 = vpop.f32.mrf.mxu1  ;;  %v1768_v57 = vpop.f32.mrf.mxu0 }
 0x6ca   : > { %v2916_v56 = vld [vmem:[%s3830_s18 + $0x60] sm:$0xf] }
 0x6ce   : > { %v1740_v59 = vpop.f32.mrf.mxu3 }
 0x6cf   : > { %v1773_v60 = vadd.f32 %v1772_v58, %v1740_v59  ;;  %v3184_v58 = vld [vmem:[%s3830_s18 + $0x64] sm:$0xf] }
 0x6d1   : > { %v1774_v61 = vadd.f32 %v1773_v60, %v1768_v57  ;;  %v1770_v62 = vpop.f32.mrf.mxu0  ;;  %v3186_v57 = vld [vmem:[%s3830_s18 + $0x6c] sm:$0xf0]  ;;  %v2918_v60 = vld [vmem:[%s3830_s18 + $0x70] sm:$0xf0] }
 0x6d2   : > { %v2917_v59 = vor.u32 %v3186_v57, %v2916_v56  ;;  %v3187_v62 = vld [vmem:[%s3830_s18 + $0x74] sm:$0xf0]  ;;  %v3357_v56 = vld [vmem:[%s879_s30] ss:$0 sm:$0xff] }
 0x6d3   : > { %v1775_v0 = vadd.f32 %v1774_v61, %v3928_v19  ;;  %v2990_v19 = vld [vmem:[%s3830_s18 + $0xf8] sm:$0xf0]  ;;  %v2924_v61 = vld [vmem:[%s3830_s18 + $0x68] sm:$0xf] }
 0x6d4   : > { %v2993_v13 = vor.u32 %v3201_v12, %v2990_v19  ;;  %2018 = vmatpush.bf16.msrb.mxu1 %v2917_v59  ;;  %v2905_v12 = vor.u32 %v3180_v6, %v2902_v9  ;;  %v2909_v19 = vor.u32 %v3183_v11, %v2908_v10  ;;  %v3225_v6 = vld [vmem:[%s3832_s24 + $0xa8] sm:$0xff]  ;;  %v3231_v9 = vld [vmem:[%s3832_s24 + $0xd8] sm:$0xff]  ;;  %v3216_v10 = vld [vmem:[%s3832_s24 + $0x60] sm:$0xff] }
 0x6d5   : > { %v4073_v38 = vadd.f32 %v3355_v63, %v1775_v0  ;;  %v2921_v63 = vor.u32 %v3184_v58, %v2918_v60  ;;  %v2925_v0 = vor.u32 %v3187_v62, %v2924_v61  ;;  %v3210_v60 = vld [vmem:[%s3832_s24 + $0x30] sm:$0xff]  ;;  %v3227_v62 = vld [vmem:[%s3832_s24 + $0xb8] sm:$0xff]  ;;  %v3224_v11 = vld [vmem:[%s3832_s24 + $0xa0] sm:$0xff] }
 0x6d6   : > { %v1742_v1 = vpop.f32.mrf.mxu3  ;;  %2053 = vmatpush.bf16.msra.mxu0 %v2993_v13  ;;  %v3181_v13 = vld [vmem:[%s3830_s18 + $0x4c] sm:$0xf]  ;;  %v3234_v61 = vld [vmem:[%s3832_s24 + $0xf0] sm:$0xff] }
 0x6d7   : > { %1783 = vadd.xlane.f32.xlu2 %v4073_v38  ;;  %v3185_v1 = vld [vmem:[%s3830_s18 + $0x6c] sm:$0xf]  ;;  %2031 = vmatpush.bf16.msrb.mxu2 %v2921_v63 }
 0x6d8   : > { %v2929_v3 = vor.u32 %v3185_v1, %v2926_v2  ;;  %2044 = vmatpush.bf16.msrb.mxu3 %v2925_v0  ;;  %2019 = vmatpush.bf16.msrb.mxu1 %v2901_v8  ;;  %v3209_v63 = vld [vmem:[%s3832_s24 + $0x28] sm:$0xff]  ;;  %v3218_v1 = vld [vmem:[%s3832_s24 + $0x70] sm:$0xff]  ;;  %v3207_v8 = vld [vmem:[%s3832_s24 + $0x18] sm:$0xff] }
 0x6d9   : > { %v3233_v0 = vld [vmem:[%s3832_s24 + $0xe8] sm:$0xff]  ;;  %v3226_v2 = vld [vmem:[%s3832_s24 + $0xb0] sm:$0xff] }
 0x6da   : > { %2054 = vmatpush.bf16.msra.mxu0 %v2977_v29  ;;  %v2897_v29 = vor.u32 %v3177_v26, %v2894_v27  ;;  %v3212_v26 = vld [vmem:[%s3832_s24 + $0x40] sm:$0xff] }
 0x6db   : > { %2032 = vmatpush.bf16.msrb.mxu2 %v2905_v12  ;;  %v3206_v12 = vld [vmem:[%s3832_s24 + $0x10] sm:$0xff]  ;;  %v3220_v27 = vld [vmem:[%s3832_s24 + $0x80] sm:$0xff] }
 0x6dc   : > { %2045 = vmatpush.bf16.msrb.mxu3 %v2909_v19  ;;  %v3230_v19 = vld [vmem:[%s3832_s24 + $0xd0] sm:$0xff] }
 0x6de   : > { %2055 = vmatpush.bf16.msra.mxu0 %v2961_v43 }
 0x6df   : > { %2033 = vmatpush.bf16.msrb.mxu2 %v2889_v24  ;;  %v1844_v24 = vld [vmem:[%s3887_s23] sm:$0xf] }
 0x6e0   : > { %2046 = vmatpush.bf16.msrb.mxu3 %v2893_v25  ;;  %v1846_v25 = vperm.slane %v1844_v24, 0  ;;  %v1849_v28 = vperm.slane %v1844_v24, 3  ;;  %v1848_v37 = vperm.slane %v1844_v24, 2 }
 0x6e2   : > { %2056 = vmatpush.bf16.msra.mxu0 %v2945_v55 }
 0x6e3   : > { %2034 = vmatpush.bf16.msrb.mxu2 %v2873_v34  ;;  %v1847_v34 = vperm.slane %v1844_v24, 1 }
 0x6e4   : > { %2047 = vmatpush.bf16.msrb.mxu3 %v2877_v40 }
 0x6e6   : > { %2057 = vmatpush.bf16.msra.mxu0 %v2929_v3  ;;  %v3208_v3 = vld [vmem:[%s3832_s24 + $0x20] sm:$0xff] }
 0x6e8   : > { %2388 = vmatpush.bf16.msra.mxu3 %v3227_v62 }
 0x6ec   : > { %2389 = vmatpush.bf16.msra.mxu3 %v3226_v2 }
 0x6f0   : > { %2390 = vmatpush.bf16.msra.mxu3 %v3225_v6 }
 0x6f4   : > { %2391 = vmatpush.bf16.msra.mxu3 %v3224_v11 }
 0x74a   : > { %v1784_v14 = vpop.xlane.xlu2 %1783 }
 0x74b   : > { %v1785_v15 = vmul.f32 %v1784_v14, %v3937_v35  ;;  %v2910_v14 = vld [vmem:[%s3830_s18 + $0x58] sm:$0xf0] }
 0x74d   : > { %v4086_v16 = vsub.f32 %v4073_v38, %v1785_v15  ;;  %v2913_v15 = vor.u32 %v3181_v13, %v2910_v14  ;;  %v3215_v13 = vld [vmem:[%s3832_s24 + $0x58] sm:$0xff] }
 0x74e   : > { %v3223_v14 = vld [vmem:[%s3832_s24 + $0x98] sm:$0xff] }
 0x74f   : > { %v1787_v17 = vmul.f32 %v4086_v16, %v4086_v16  ;;  %2058 = vmatpush.bf16.msra.mxu0 %v2913_v15  ;;  %2392 = vmatpush.bf16.msra.mxu3 %v3223_v14  ;;  %v3205_v15 = vld [vmem:[%s3832_s24 + $0x8] sm:$0xff] }
 0x751   : > { %1788 = vadd.xlane.f32.xlu1 %v1787_v17  ;;  %v2884_v17 = vld [vmem:[%s3830_s18 + $0x20] sm:$0xf] }
 0x752   : > { %v2885_v7 = vor.u32 %v3178_v18, %v2884_v17  ;;  %v3229_v17 = vld [vmem:[%s3832_s24 + $0xc8] sm:$0xff]  ;;  %v3214_v18 = vld [vmem:[%s3832_s24 + $0x50] sm:$0xff] }
 0x753   : > { %2059 = vmatpush.bf16.msra.mxu0 %v2897_v29  ;;  %2393 = vmatpush.bf16.msra.mxu3 %v3222_v20 }
 0x754   : > { %2020 = vmatpush.bf16.msrb.mxu1 %v2885_v7  ;;  %v3204_v7 = vld [vmem:[%s3832_s24] sm:$0xff] }
 0x757   : > { %2060 = vmatpush.bf16.msra.mxu0 %v2881_v42  ;;  %2394 = vmatpush.bf16.msra.mxu3 %v3221_v23 }
 0x758   : > { %2021 = vmatpush.bf16.msrb.mxu1 %v2869_v33 }
 0x75b   : > { %2401 = vmatpush.bf16.msrb.mxu0 %v3235_v45  ;;  %2395 = vmatpush.bf16.msra.mxu3 %v3220_v27 }
 0x75c   : > { %2362 = vmatpush.bf16.msra.mxu1 %v3211_v44 }
 0x75f   : > { %2402 = vmatpush.bf16.msrb.mxu0 %v3234_v61 }
 0x760   : > { %2363 = vmatpush.bf16.msra.mxu1 %v3210_v60 }
 0x763   : > { %2403 = vmatpush.bf16.msrb.mxu0 %v3233_v0 }
 0x764   : > { %2364 = vmatpush.bf16.msra.mxu1 %v3209_v63 }
 0x767   : > { %2404 = vmatpush.bf16.msrb.mxu0 %v3232_v4 }
 0x768   : > { %2365 = vmatpush.bf16.msra.mxu1 %v3208_v3 }
 0x76b   : > { %2405 = vmatpush.bf16.msrb.mxu0 %v3231_v9 }
 0x76c   : > { %2366 = vmatpush.bf16.msra.mxu1 %v3207_v8 }
 0x76f   : > { %2406 = vmatpush.bf16.msrb.mxu0 %v3230_v19 }
 0x770   : > { %2367 = vmatpush.bf16.msra.mxu1 %v3206_v12 }
 0x773   : > { %2407 = vmatpush.bf16.msrb.mxu0 %v3229_v17 }
 0x774   : > { %2368 = vmatpush.bf16.msra.mxu1 %v3205_v15 }
 0x777   : > { %2408 = vmatpush.bf16.msrb.mxu0 %v3228_v21 }
 0x778   : > { %2369 = vmatpush.bf16.msra.mxu1 %v3204_v7 }
 0x7c4   : > { %v1789_v43 = vpop.xlane.xlu1 %1788 }
 0x7c5   : > { %v1790_v46 = vmul.f32 %v1789_v43, %v3937_v35  ;;  %v3356_v35 = vld [vmem:[%s876_s0] ss:$0 sm:$0xff] }
 0x7c7   : > { %v1791_v47 = vadd.f32 1e-05, %v1790_v46 }
 0x7c9   : > { %3379 = vrsqrt.f32 %v1791_v47  ;;  %vm1798_vm4 = vweird.f32 %v1791_v47 }
 0x7cf   : > { %v3380_v48 = vpop.eup %3379 }
 0x7d0   : > { %v1793_v49 = vmul.f32 %v3380_v48, %v1791_v47  ;;  %vm1799_vm3 = vweird.f32 %v3380_v48 }
 0x7d1   : > { %vm1800_vm5 = vmor %vm1798_vm4, %vm1799_vm3 }
 0x7d2   : > { %v1794_v50 = vmul.f32 %v3380_v48, %v1793_v49 }
 0x7d4   : > { %v1795_v51 = vmul.f32 0.5, %v1794_v50 }
 0x7d6   : > { %v1796_v52 = vsub.f32 1.5, %v1795_v51 }
 0x7d8   : > { %v1797_v53 = vmul.f32 %v3380_v48, %v1796_v52 }
 0x7da   : > { %v1801_v54 = vsel %vm1800_vm5, %v3380_v48, %v1797_v53 }
 0x7db   : > { %v1802_v55 = vmul.f32 %v1801_v54, %v4086_v16  ;;  %v3219_v16 = vld [vmem:[%s3832_s24 + $0x78] sm:$0xff] }
 0x7dc   : > { %2375 = vmatpush.bf16.msra.mxu2 %v3219_v16 }
 0x7dd   : > { %v1806_v57 = vmul.f32 %v3356_v35, %v1802_v55 }
 0x7df   : > { %v1810_v58 = vadd.f32 %v3357_v56, %v1806_v57 }
 0x7e0   : > { %2376 = vmatpush.bf16.msra.mxu2 %v3218_v1 }
 0x7e1   : > { %v1811_v59 = vpack.c.bf16 %v1810_v58, %v1810_v58 }
 0x7e3   : > { %2022 = vmatmul.bf16.vlgmr.msrb.gmra.mxu1 %v1811_v59  ;;  %2035 = vmatmul.bf16.vlgmr.msrb.gmra.mxu2 %v1811_v59 }
 0x7e4   : > { %2048 = vmatmul.bf16.vlgmr.msrb.gmra.mxu3 %v1811_v59  ;;  %2061 = vmatmul.bf16.vlgmr.msra.gmra.mxu0 %v1811_v59 }
 0x7e5   : > { %2377 = vmatpush.bf16.msra.mxu2 %v3217_v5 }
 0x7e9   : > { %2378 = vmatpush.bf16.msra.mxu2 %v3216_v10 }
 0x7ed   : > { %2379 = vmatpush.bf16.msra.mxu2 %v3215_v13 }
 0x7f1   : > { %2380 = vmatpush.bf16.msra.mxu2 %v3214_v18 }
 0x7f5   : > { %2381 = vmatpush.bf16.msra.mxu2 %v3213_v22 }
 0x7f9   : > { %2382 = vmatpush.bf16.msra.mxu2 %v3212_v26 }
 0x860   : > { %v2023_v29 = vpop.f32.mrf.mxu1 }
 0x861   : > { %v2024_v30 = vadd.f32 %v2023_v29, %v1846_v25  ;;  %v2062_v31 = vpop.f32.mrf.mxu0  ;;  %v3358_v29 = vld [vmem:[%s886_s8] ss:$0 sm:$0xff] }
 0x862   : > { %v2063_v32 = vadd.f32 %v2062_v31, %v1849_v28 }
 0x863   : > { %v2066_v33 = vmul.f32 %v2024_v30, %v2024_v30 }
 0x864   : > { %v2069_v36 = vmul.f32 %v2063_v32, %v2063_v32 }
 0x865   : > { %v2070_v39 = vmul.f32 %v2066_v33, %v2024_v30 }
 0x866   : > { %v2073_v40 = vmul.f32 %v2069_v36, %v2063_v32  ;;  %v2036_v41 = vpop.f32.mrf.mxu2 }
 0x867   : > { %v2074_v42 = vmul.f32 0.044715, %v2070_v39  ;;  %v2037_v43 = vadd.f32 %v2036_v41, %v1847_v34  ;;  %v2049_v44 = vpop.f32.mrf.mxu3 }
 0x868   : > { %v2077_v45 = vmul.f32 0.044715, %v2073_v40  ;;  %v2050_v46 = vadd.f32 %v2049_v44, %v1848_v37  ;;  %v2025_v47 = vpop.f32.mrf.mxu1 }
 0x869   : > { %v2078_v48 = vadd.f32 %v2074_v42, %v2024_v30  ;;  %v2067_v49 = vmul.f32 %v2037_v43, %v2037_v43  ;;  %v2064_v50 = vpop.f32.mrf.mxu0 }
 0x86a   : > { %v2081_v51 = vadd.f32 %v2077_v45, %v2063_v32  ;;  %v2068_v52 = vmul.f32 %v2050_v46, %v2050_v46 }
 0x86b   : > { %v2082_v53 = vmul.f32 0.7978846, %v2078_v48  ;;  %v2071_v35 = vmul.f32 %v2067_v49, %v2037_v43 }
 0x86c   : > { %v2085_v54 = vmul.f32 0.7978846, %v2081_v51  ;;  %v2072_v55 = vmul.f32 %v2068_v52, %v2050_v46 }
 0x86d   : > { %3381 = vtanh.f32 %v2082_v53  ;;  %v2075_v56 = vmul.f32 0.044715, %v2071_v35 }
 0x86e   : > { %3383 = vtanh.f32 %v2085_v54  ;;  %v2076_v57 = vmul.f32 0.044715, %v2072_v55  ;;  %v2038_v58 = vpop.f32.mrf.mxu2 }
 0x86f   : > { %v2079_v59 = vadd.f32 %v2075_v56, %v2037_v43  ;;  %v2051_v60 = vpop.f32.mrf.mxu3 }
 0x870   : > { %v2080_v61 = vadd.f32 %v2076_v57, %v2050_v46 }
 0x871   : > { %v2083_v16 = vmul.f32 0.7978846, %v2079_v59 }
 0x872   : > { %v2084_v62 = vmul.f32 0.7978846, %v2080_v61 }
 0x873   : > { %v3382_v63 = vpop.eup %3381  ;;  %3385 = vtanh.f32 %v2083_v16 }
 0x874   : > { %v3384_v0 = vpop.eup %3383  ;;  %3387 = vtanh.f32 %v2084_v62  ;;  %v2090_v1 = vadd.f32 1.0, %v3382_v63 }
 0x875   : > { %v2093_v2 = vadd.f32 1.0, %v3384_v0 }
 0x876   : > { %v2094_v3 = vmul.f32 0.5, %v2090_v1 }
 0x877   : > { %v2097_v4 = vmul.f32 0.5, %v2093_v2 }
 0x878   : > { %v2098_v5 = vmul.f32 %v2094_v3, %v2024_v30 }
 0x879   : > { %v3386_v6 = vpop.eup %3385  ;;  %v2101_v8 = vmul.f32 %v2097_v4, %v2063_v32 }
 0x87a   : > { %v3388_v9 = vpop.eup %3387  ;;  %v2102_v10 = vpack.c.bf16 %v2098_v5, %v2098_v5  ;;  %v2091_v11 = vadd.f32 1.0, %v3386_v6 }
 0x87b   : > { %v2105_v12 = vpack.c.bf16 %v2101_v8, %v2101_v8  ;;  %v2092_v19 = vadd.f32 1.0, %v3388_v9 }
 0x87c   : > { %2370 = vmatmul.bf16.vlgmr.msra.gmra.mxu1 %v2102_v10  ;;  %v2095_v13 = vmul.f32 0.5, %v2091_v11 }
 0x87d   : > { %2409 = vmatmul.bf16.vlgmr.msrb.gmra.mxu0 %v2105_v12  ;;  %v2096_v14 = vmul.f32 0.5, %v2092_v19 }
 0x87e   : > { %v2099_v15 = vmul.f32 %v2095_v13, %v2037_v43 }
 0x87f   : > { %v2100_v17 = vmul.f32 %v2096_v14, %v2050_v46 }
 0x880   : > { %v2103_v18 = vpack.c.bf16 %v2099_v15, %v2099_v15 }
 0x881   : > { %v2104_v20 = vpack.c.bf16 %v2100_v17, %v2100_v17 }
 0x882   : > { %2383 = vmatmul.bf16.vlgmr.msra.gmra.mxu2 %v2103_v18 }
 0x883   : > { %2396 = vmatmul.bf16.vlgmr.msra.gmra.mxu3 %v2104_v20 }
 0x8f9   : > { %v2371_v7 = vpop.f32.mrf.mxu1 }
 0x8fa   : > { %v2410_v21 = vpop.f32.mrf.mxu0 }
 0x901   : > { %v2373_v22 = vpop.f32.mrf.mxu1 }
 0x902   : > { %v2412_v23 = vpop.f32.mrf.mxu0 }
 0x905   : > { %v2384_v24 = vpop.f32.mrf.mxu2 }
 0x906   : > { %v2385_v25 = vadd.f32 %v2384_v24, %v2371_v7  ;;  %v2397_v26 = vpop.f32.mrf.mxu3 }
 0x908   : > { %v2398_v27 = vadd.f32 %v2397_v26, %v2385_v25 }
 0x90a   : > { %v2411_v28 = vadd.f32 %v2410_v21, %v2398_v27 }
 0x90c   : > { %v2414_v30 = vadd.f32 %v2411_v28, %v4073_v38 }
 0x90d   : > { %v2386_v31 = vpop.f32.mrf.mxu2 }
 0x90e   : > { %v2419_v32 = vadd.f32 %v3358_v29, %v2414_v30  ;;  %v2399_v33 = vpop.f32.mrf.mxu3 }
 0x910   : > { %2420 = vst [vmem:[%s3892_s28] sm:$0xff] %v2419_v32 }
 0x911 PF: > { %s4311_s0 = sld [smem:[#allocation19_spill]] }
 0x912   : > { %s4313_s30 = sld [smem:[#allocation16_spill]] }
 0x913   : > { %s4314_s20 = sld [smem:[#allocation22_spill]] }
 0x914   : > { %s4315_s21 = sld [smem:[#allocation17_spill]] }
 0x915   : > { %s4316_s1 = sld [smem:[#allocation18_spill]] }
 0x916   : > { %s4317_s22 = sld [smem:[#allocation20_spill]] }
 0x917   : > { %s36_s23 = sadd.s32 1, %s4311_s0   ;;  %s4312_s0 = sld [smem:[#allocation15_spill]] }
 0x918   : > { %p33_p5 = scmp.ge.s32.totalorder %s36_s23, 6   ;;  %s4318_s2 = sld [smem:[#allocation21_spill]] }
 0x91a   :  { %35 = sbr.rel (!%p33_p5) target bundleno = 28 (0x1c), region = 208 }
 0x91f   :  { %2440 = vsyncpa [#allocation6], 1 }
 0x920   :  { %2442 = vsyncpa [#allocation6 + $0x1], 1 }
 0x921   :  { %2443 = vsyncpa [#allocation8], 1 }
 0x922   :  { %2445 = vsyncpa [#allocation8 + $0x1], 1 }
 0x923   :  { %2446 = vsyncpa [#allocation11], 1 }
 0x924   :  { %2448 = vsyncpa [#allocation11 + $0x1], 1 }

</bundles_post_ra>
